<compile_context>
chip_gen: v5e
topology: v5e:2x2
jax: 0.10.0
libtpu: 0.0.40
codegen_flags: <defaults>
</compile_context>

<pallas_src>
import functools

import jax
import jax.numpy as jnp
from jax.experimental import pallas as pl
from jax.experimental.pallas import tpu as pltpu


_EDGE_CONTRACT = (((0,), (0,)), ((), ()))   # contract the edge (sublane) axis


def _rep_gsum(f_in, f_out):
  """Constant 0/1 replicate / group-sum matrices, built in-kernel from iotas.

  rep  (Fin, Fin*Fout):  rep[f, c]  = 1  iff  c // Fout == f   (range compare)
  gsum (Fin*Fout, Fout): gsum[c, o] = 1  iff  c %  Fout == o   (congruence OR)
  Only iota / integer mul / compare ops are used (no vector int div/mod).
  """
  fio = f_in * f_out
  row = jax.lax.broadcasted_iota(jnp.int32, (f_in, fio), 0)
  col = jax.lax.broadcasted_iota(jnp.int32, (f_in, fio), 1)
  lo = row * f_out
  rep = ((col >= lo) & (col < lo + f_out)).astype(jnp.float32)

  c = jax.lax.broadcasted_iota(jnp.int32, (fio, f_out), 0)
  o = jax.lax.broadcasted_iota(jnp.int32, (fio, f_out), 1)
  hit = (c == o)
  for f in range(1, f_in):                      # trace-time unrolled, tiny
    hit = hit | (c == o + f * f_out)
  gsum = hit.astype(jnp.float32)
  return rep, gsum


def _fused_gcn_kernel(
    x_ref, ea_ref, ei_ref,
    w1a_ref, w2a_ref, wra_ref,
    w1b_ref, w2b_ref, wrb_ref,
    bias_ref,
    o_ref, *, n_nodes, n_edges):
  """Fused: x = NNConv_a(x); x = relu(x); x = NNConv_b(x)."""
  x0 = x_ref[...]                                   # (N, Fin0)
  ea = ea_ref[...]                                  # (E, Fe)
  src = ei_ref[:, 0:1]                              # (E, 1) int32
  dst = ei_ref[:, 1:2]                              # (E, 1) int32

  # One-hot gather/scatter matrices with edges on the sublane axis: (E, N).
  node_iota = jax.lax.broadcasted_iota(jnp.int32, (n_edges, n_nodes), 1)
  src_oh = (node_iota == src).astype(jnp.float32)   # (E, N)
  dst_oh = (node_iota == dst).astype(jnp.float32)   # (E, N)

  def nnconv(x, w1, w2, wr, b1, b2, bias, inv_deg):
    f_in, f_out = wr.shape
    rep, gsum = _rep_gsum(f_in, f_out)
    # --- edge MLP: Linear -> ReLU -> Linear ---------------------------------
    h = jnp.maximum(jnp.dot(ea, w1, preferred_element_type=jnp.float32) + b1, 0.0)
    w = jnp.dot(h, w2, preferred_element_type=jnp.float32) + b2     # (E, Fin*Fout)
    # --- gather source node features via the one-hot matmul -----------------
    xs = jnp.dot(src_oh, x, preferred_element_type=jnp.float32)     # (E, Fin)
    # --- per-edge matmul  msg[e,o] = sum_f xs[e,f] * w[e, f*Fout+o]  ---------
    # replicate on the MXU, lane-dense VPU multiply, group-sum on the MXU.
    xs_rep = jnp.dot(xs, rep, preferred_element_type=jnp.float32)   # (E, Fin*Fout)
    msg = jnp.dot(xs_rep * w, gsum,
                  preferred_element_type=jnp.float32)               # (E, Fout)
    # --- scatter-mean onto destination nodes (contract the edge axis) -------
    if inv_deg is None:
      # Fuse the in-degree into this scatter: a ones column rides along and the
      # degree is split off the last lane (no separate 1-lane MXU pass).
      msg_aug = jnp.concatenate(
          [msg, jnp.ones((n_edges, 1), jnp.float32)], axis=1)       # (E, Fout+1)
      agg_aug = jax.lax.dot_general(dst_oh, msg_aug,
                                    dimension_numbers=_EDGE_CONTRACT,
                                    preferred_element_type=jnp.float32)
      agg = agg_aug[:, :f_out]                                      # (N, Fout)
      deg = agg_aug[:, f_out:f_out + 1]                             # (N, 1)
      inv_deg = pl.reciprocal(jnp.maximum(deg, 1.0), approx=False)
    else:
      agg = jax.lax.dot_general(dst_oh, msg,
                                dimension_numbers=_EDGE_CONTRACT,
                                preferred_element_type=jnp.float32) # (N, Fout)
    # --- root weight + bias --------------------------------------------------
    out = agg * inv_deg + jnp.dot(x, wr, preferred_element_type=jnp.float32) + bias
    return out, inv_deg

  # Slice the packed bias slab (rows: b1a, b2a, bias_a, b1b, b2b, bias_b).
  nh_a, fio_a, fo_a = w1a_ref.shape[1], w2a_ref.shape[1], wra_ref.shape[1]
  nh_b, fio_b, fo_b = w1b_ref.shape[1], w2b_ref.shape[1], wrb_ref.shape[1]
  b1a = bias_ref[0:1, :nh_a]
  b2a = bias_ref[1:2, :fio_a]
  ba = bias_ref[2:3, :fo_a]
  b1b = bias_ref[3:4, :nh_b]
  b2b = bias_ref[4:5, :fio_b]
  bb = bias_ref[5:6, :fo_b]

  h1, inv_deg = nnconv(x0, w1a_ref[...], w2a_ref[...], wra_ref[...],
                       b1a, b2a, ba, None)
  h1 = jnp.maximum(h1, 0.0)                         # relu between the two layers
  out, _ = nnconv(h1, w1b_ref[...], w2b_ref[...], wrb_ref[...],
                  b1b, b2b, bb, inv_deg)
  o_ref[...] = out.astype(o_ref.dtype)


def dynamic_gcn_forward(x, edge_index, edge_attr, params_init, params_final):
  """x = NNConv_init(x); x = relu(x); x = NNConv_final(x)  — one pallas_call."""
  n_nodes = x.shape[0]
  n_edges = edge_attr.shape[0]

  w1a, b1a, w2a, b2a, wra, ba = params_init
  w1b, b1b, w2b, b2b, wrb, bb = params_final
  f_out = wrb.shape[1]

  # edge_index (2, E) PyG convention -> one (E, 2) int32 operand (src, dst).
  ei = jnp.transpose(edge_index.astype(jnp.int32))                  # (E, 2)

  # Pack all six bias vectors of both layers into ONE lane-dense slab.
  biases = (b1a, b2a, ba, b1b, b2b, bb)
  width = max(b.shape[0] for b in biases)
  bias_slab = jnp.concatenate(
      [jnp.pad(b, (0, width - b.shape[0])).reshape(1, width) for b in biases],
      axis=0)                                                       # (6, width)

  operands = (x, edge_attr, ei, w1a, w2a, wra, w1b, w2b, wrb, bias_slab)

  kernel = functools.partial(_fused_gcn_kernel,
                             n_nodes=n_nodes, n_edges=n_edges)
  vmem = pl.BlockSpec(memory_space=pltpu.MemorySpace.VMEM)
  return pl.pallas_call(
      kernel,
      out_shape=jax.ShapeDtypeStruct((n_nodes, f_out), jnp.float32),
      in_specs=[vmem] * len(operands),
      out_specs=vmem,
  )(*operands)


# ------------------------- pure-JAX reference (for check) ---------------------
def _nnconv_ref(x, edge_attr, src, dst, params, apply_relu):
  w1, b1, w2, b2, wr, bias = params
  n_nodes, f_in = x.shape
  f_out = wr.shape[1]
  h = jax.nn.relu(edge_attr @ w1 + b1)
  w = (h @ w2 + b2).reshape(-1, f_in, f_out)
  xs = x[src]
  msg = jnp.einsum('ef,efo->eo', xs, w)
  agg = jnp.zeros((n_nodes, f_out), jnp.float32).at[dst].add(msg)
  deg = jnp.zeros((n_nodes,), jnp.float32).at[dst].add(1.0)
  agg = agg / jnp.maximum(deg, 1.0)[:, None]
  out = agg + x @ wr + bias
  return jax.nn.relu(out) if apply_relu else out


def _dynamic_gcn_ref(x, edge_index, edge_attr, params_init, params_final):
  src, dst = edge_index[0], edge_index[1]
  x = _nnconv_ref(x, edge_attr, src, dst, params_init, apply_relu=True)
  return _nnconv_ref(x, edge_attr, src, dst, params_final, apply_relu=False)


# -------------------------------- setup ---------------------------------------
def _uniform(key, shape, fan_in):
  bound = 1.0 / jnp.sqrt(jnp.maximum(fan_in, 1)).astype(jnp.float32)
  return jax.random.uniform(key, shape, jnp.float32, -bound, bound)


def make_nnconv_params(key, f_in, f_out, f_edge, nn_hidden):
  """Params for NNConv(f_in, f_out, nn=Seq(Linear(f_edge, nn_hidden), ReLU,
     Linear(nn_hidden, f_in*f_out)), aggr='mean') with root weight + bias."""
  k = jax.random.split(key, 6)
  w1 = _uniform(k[0], (f_edge, nn_hidden), f_edge)
  b1 = _uniform(k[1], (nn_hidden,), f_edge)
  w2 = _uniform(k[2], (nn_hidden, f_in * f_out), nn_hidden)
  b2 = _uniform(k[3], (f_in * f_out,), nn_hidden)
  wr = _uniform(k[4], (f_in, f_out), f_in)
  bias = _uniform(k[5], (f_out,), f_in)
  return (w1, b1, w2, b2, wr, bias)


if __name__ == "__main__":
  # Small, deterministic problem:
  N = 16          # nodes
  E = 32          # edges
  F_NODE = 4      # num_node_feats
  F_EDGE = 4      # num_edge_feats
  HIDDEN = 32     # hidden_units
  OUT = 8         # out_channels
  NN1H = 2        # nn1h
  NNIH = 8        # nnih

  key = jax.random.PRNGKey(0)
  kx, ke, ks, kd, kp1, kp2 = jax.random.split(key, 6)

  x = jax.random.normal(kx, (N, F_NODE), jnp.float32)
  edge_attr = jax.random.normal(ke, (E, F_EDGE), jnp.float32)
  src = jax.random.randint(ks, (E,), 0, N, jnp.int32)
  dst = jax.random.randint(kd, (E,), 0, N, jnp.int32)
  edge_index = jnp.stack([src, dst], axis=0)           # (2, E), PyG convention

  # num_hidden_layers=1 -> initial NNConv(F_NODE->HIDDEN, nn1h),
  #                        final   NNConv(HIDDEN->OUT,   nnih)
  params_init = make_nnconv_params(kp1, F_NODE, HIDDEN, F_EDGE, NN1H)
  params_final = make_nnconv_params(kp2, HIDDEN, OUT, F_EDGE, NNIH)

  out = dynamic_gcn_forward(x, edge_index, edge_attr, params_init, params_final)
  out = jax.block_until_ready(out)

  ref = _dynamic_gcn_ref(x, edge_index, edge_attr, params_init, params_final)
  assert out.shape == (N, OUT)
  assert jnp.allclose(out, ref, atol=1e-4, rtol=1e-4), "mismatch vs reference"

  print("KERNEL_OK")
</pallas_src>

<mosaic_0001>
module attributes {stable_mosaic.version = 11 : i64} {
  func.func @_fused_gcn_kernel(%arg0: memref<16x4xf32, #tpu.memory_space<vmem>>, %arg1: memref<32x4xf32, #tpu.memory_space<vmem>>, %arg2: memref<32x2xi32, #tpu.memory_space<vmem>>, %arg3: memref<4x2xf32, #tpu.memory_space<vmem>>, %arg4: memref<2x128xf32, #tpu.memory_space<vmem>>, %arg5: memref<4x32xf32, #tpu.memory_space<vmem>>, %arg6: memref<4x8xf32, #tpu.memory_space<vmem>>, %arg7: memref<8x256xf32, #tpu.memory_space<vmem>>, %arg8: memref<32x8xf32, #tpu.memory_space<vmem>>, %arg9: memref<6x256xf32, #tpu.memory_space<vmem>>, %arg10: memref<16x8xf32, #tpu.memory_space<vmem>>) attributes {dimension_semantics = [], scalar_prefetch = 0 : i64, scratch_operands = 0 : i64, tpu.core_type = #tpu.core_type<tc>} {
    %c0 = arith.constant 0 : index
    %c0_0 = arith.constant 0 : index
    %0 = vector.load %arg0[%c0, %c0_0] : memref<16x4xf32, #tpu.memory_space<vmem>>, vector<16x4xf32>
    %c0_1 = arith.constant 0 : index
    %c0_2 = arith.constant 0 : index
    %1 = vector.load %arg1[%c0_1, %c0_2] : memref<32x4xf32, #tpu.memory_space<vmem>>, vector<32x4xf32>
    %c0_3 = arith.constant 0 : index
    %c0_4 = arith.constant 0 : index
    %2 = vector.load %arg2[%c0_3, %c0_4] : memref<32x2xi32, #tpu.memory_space<vmem>>, vector<32x1xi32>
    %c0_5 = arith.constant 0 : index
    %c1 = arith.constant 1 : index
    %3 = vector.load %arg2[%c0_5, %c1] : memref<32x2xi32, #tpu.memory_space<vmem>>, vector<32x1xi32>
    %4 = tpu.iota {dimensions = array<i32: 1>} : vector<32x16xi32>
    %5 = vector.broadcast %2 : vector<32x1xi32> to vector<32x16xi32>
    %6 = arith.cmpi eq, %4, %5 : vector<32x16xi32>
    %7 = arith.extui %6 : vector<32x16xi1> to vector<32x16xi32>
    %8 = arith.sitofp %7 : vector<32x16xi32> to vector<32x16xf32>
    %9 = vector.broadcast %3 : vector<32x1xi32> to vector<32x16xi32>
    %10 = arith.cmpi eq, %4, %9 : vector<32x16xi32>
    %11 = arith.extui %10 : vector<32x16xi1> to vector<32x16xi32>
    %12 = arith.sitofp %11 : vector<32x16xi32> to vector<32x16xf32>
    %c0_6 = arith.constant 0 : index
    %c0_7 = arith.constant 0 : index
    %13 = vector.load %arg9[%c0_6, %c0_7] : memref<6x256xf32, #tpu.memory_space<vmem>>, vector<1x2xf32>
    %c1_8 = arith.constant 1 : index
    %c0_9 = arith.constant 0 : index
    %14 = vector.load %arg9[%c1_8, %c0_9] : memref<6x256xf32, #tpu.memory_space<vmem>>, vector<1x128xf32>
    %c2 = arith.constant 2 : index
    %c0_10 = arith.constant 0 : index
    %15 = vector.load %arg9[%c2, %c0_10] : memref<6x256xf32, #tpu.memory_space<vmem>>, vector<1x32xf32>
    %c3 = arith.constant 3 : index
    %c0_11 = arith.constant 0 : index
    %16 = vector.load %arg9[%c3, %c0_11] : memref<6x256xf32, #tpu.memory_space<vmem>>, vector<1x8xf32>
    %c4 = arith.constant 4 : index
    %c0_12 = arith.constant 0 : index
    %17 = vector.load %arg9[%c4, %c0_12] : memref<6x256xf32, #tpu.memory_space<vmem>>, vector<1x256xf32>
    %c5 = arith.constant 5 : index
    %c0_13 = arith.constant 0 : index
    %18 = vector.load %arg9[%c5, %c0_13] : memref<6x256xf32, #tpu.memory_space<vmem>>, vector<1x8xf32>
    %c0_14 = arith.constant 0 : index
    %c0_15 = arith.constant 0 : index
    %19 = vector.load %arg3[%c0_14, %c0_15] : memref<4x2xf32, #tpu.memory_space<vmem>>, vector<4x2xf32>
    %c0_16 = arith.constant 0 : index
    %c0_17 = arith.constant 0 : index
    %20 = vector.load %arg4[%c0_16, %c0_17] : memref<2x128xf32, #tpu.memory_space<vmem>>, vector<2x128xf32>
    %c0_18 = arith.constant 0 : index
    %c0_19 = arith.constant 0 : index
    %21 = vector.load %arg5[%c0_18, %c0_19] : memref<4x32xf32, #tpu.memory_space<vmem>>, vector<4x32xf32>
    %22 = tpu.iota {dimensions = array<i32: 0>} : vector<4x128xi32>
    %23 = tpu.iota {dimensions = array<i32: 1>} : vector<4x128xi32>
    %c32_i32 = arith.constant 32 : i32
    %24 = vector.broadcast %c32_i32 : i32 to vector<4x128xi32>
    %25 = arith.muli %22, %24 : vector<4x128xi32>
    %26 = arith.cmpi sge, %23, %25 : vector<4x128xi32>
    %c32_i32_20 = arith.constant 32 : i32
    %27 = vector.broadcast %c32_i32_20 : i32 to vector<4x128xi32>
    %28 = arith.addi %25, %27 : vector<4x128xi32>
    %29 = arith.cmpi slt, %23, %28 : vector<4x128xi32>
    %30 = arith.andi %26, %29 : vector<4x128xi1>
    %31 = arith.extui %30 : vector<4x128xi1> to vector<4x128xi32>
    %32 = arith.sitofp %31 : vector<4x128xi32> to vector<4x128xf32>
    %33 = tpu.iota {dimensions = array<i32: 0>} : vector<128x32xi32>
    %34 = tpu.iota {dimensions = array<i32: 1>} : vector<128x32xi32>
    %35 = arith.cmpi eq, %33, %34 : vector<128x32xi32>
    %c32_i32_21 = arith.constant 32 : i32
    %36 = vector.broadcast %c32_i32_21 : i32 to vector<128x32xi32>
    %37 = arith.addi %34, %36 : vector<128x32xi32>
    %38 = arith.cmpi eq, %33, %37 : vector<128x32xi32>
    %39 = arith.ori %35, %38 : vector<128x32xi1>
    %c64_i32 = arith.constant 64 : i32
    %40 = vector.broadcast %c64_i32 : i32 to vector<128x32xi32>
    %41 = arith.addi %34, %40 : vector<128x32xi32>
    %42 = arith.cmpi eq, %33, %41 : vector<128x32xi32>
    %43 = arith.ori %39, %42 : vector<128x32xi1>
    %c96_i32 = arith.constant 96 : i32
    %44 = vector.broadcast %c96_i32 : i32 to vector<128x32xi32>
    %45 = arith.addi %34, %44 : vector<128x32xi32>
    %46 = arith.cmpi eq, %33, %45 : vector<128x32xi32>
    %47 = arith.ori %43, %46 : vector<128x32xi1>
    %48 = arith.extui %47 : vector<128x32xi1> to vector<128x32xi32>
    %49 = arith.sitofp %48 : vector<128x32xi32> to vector<128x32xf32>
    %cst = arith.constant dense<0.000000e+00> : vector<32x2xf32>
    %50 = tpu.matmul %1, %19, %cst {dimension_numbers = #tpu.dot_dimension_numbers<[1], [0], [0], [1], [0, 0, 1, 1], [], []>} : vector<32x4xf32>, vector<4x2xf32>, vector<32x2xf32> -> vector<32x2xf32>
    %51 = vector.broadcast %13 : vector<1x2xf32> to vector<32x2xf32>
    %52 = arith.addf %50, %51 : vector<32x2xf32>
    %cst_22 = arith.constant 0.000000e+00 : f32
    %53 = vector.broadcast %cst_22 : f32 to vector<32x2xf32>
    %54 = arith.maximumf %52, %53 : vector<32x2xf32>
    %cst_23 = arith.constant dense<0.000000e+00> : vector<32x128xf32>
    %55 = tpu.matmul %54, %20, %cst_23 {dimension_numbers = #tpu.dot_dimension_numbers<[1], [0], [0], [1], [0, 0, 1, 1], [], []>} : vector<32x2xf32>, vector<2x128xf32>, vector<32x128xf32> -> vector<32x128xf32>
    %56 = vector.broadcast %14 : vector<1x128xf32> to vector<32x128xf32>
    %57 = arith.addf %55, %56 : vector<32x128xf32>
    %cst_24 = arith.constant dense<0.000000e+00> : vector<32x4xf32>
    %58 = tpu.matmul %8, %0, %cst_24 {dimension_numbers = #tpu.dot_dimension_numbers<[1], [0], [0], [1], [0, 0, 1, 1], [], []>} : vector<32x16xf32>, vector<16x4xf32>, vector<32x4xf32> -> vector<32x4xf32>
    %cst_25 = arith.constant dense<0.000000e+00> : vector<32x128xf32>
    %59 = tpu.matmul %58, %32, %cst_25 {dimension_numbers = #tpu.dot_dimension_numbers<[1], [0], [0], [1], [0, 0, 1, 1], [], []>} : vector<32x4xf32>, vector<4x128xf32>, vector<32x128xf32> -> vector<32x128xf32>
    %60 = arith.mulf %59, %57 : vector<32x128xf32>
    %cst_26 = arith.constant dense<0.000000e+00> : vector<32x32xf32>
    %61 = tpu.matmul %60, %49, %cst_26 {dimension_numbers = #tpu.dot_dimension_numbers<[1], [0], [0], [1], [0, 0, 1, 1], [], []>} : vector<32x128xf32>, vector<128x32xf32>, vector<32x32xf32> -> vector<32x32xf32>
    %cst_27 = arith.constant 1.000000e+00 : f32
    %62 = vector.broadcast %cst_27 : f32 to vector<32x1xf32>
    %63 = tpu.concatenate %61, %62 in 1 : vector<32x32xf32>, vector<32x1xf32> -> vector<32x33xf32>
    %cst_28 = arith.constant dense<0.000000e+00> : vector<16x33xf32>
    %64 = tpu.matmul %12, %63, %cst_28 {dimension_numbers = #tpu.dot_dimension_numbers<[0], [0], [1], [1], [0, 1, 1, 1], [], []>} : vector<32x16xf32>, vector<32x33xf32>, vector<16x33xf32> -> vector<16x33xf32>
    %65 = vector.extract_strided_slice %64 {offsets = [0, 0], sizes = [16, 32], strides = [1, 1]} : vector<16x33xf32> to vector<16x32xf32>
    %66 = vector.extract_strided_slice %64 {offsets = [0, 32], sizes = [16, 1], strides = [1, 1]} : vector<16x33xf32> to vector<16x1xf32>
    %cst_29 = arith.constant 1.000000e+00 : f32
    %67 = vector.broadcast %cst_29 : f32 to vector<16x1xf32>
    %68 = arith.maximumf %66, %67 : vector<16x1xf32>
    %69 = tpu.reciprocal %68 : vector<16x1xf32> -> vector<16x1xf32>
    %70 = vector.broadcast %69 : vector<16x1xf32> to vector<16x32xf32>
    %71 = arith.mulf %65, %70 : vector<16x32xf32>
    %cst_30 = arith.constant dense<0.000000e+00> : vector<16x32xf32>
    %72 = tpu.matmul %0, %21, %cst_30 {dimension_numbers = #tpu.dot_dimension_numbers<[1], [0], [0], [1], [0, 0, 1, 1], [], []>} : vector<16x4xf32>, vector<4x32xf32>, vector<16x32xf32> -> vector<16x32xf32>
    %73 = arith.addf %71, %72 : vector<16x32xf32>
    %74 = vector.broadcast %15 : vector<1x32xf32> to vector<16x32xf32>
    %75 = arith.addf %73, %74 : vector<16x32xf32>
    %cst_31 = arith.constant 0.000000e+00 : f32
    %76 = vector.broadcast %cst_31 : f32 to vector<16x32xf32>
    %77 = arith.maximumf %75, %76 : vector<16x32xf32>
    %c0_32 = arith.constant 0 : index
    %c0_33 = arith.constant 0 : index
    %78 = vector.load %arg6[%c0_32, %c0_33] : memref<4x8xf32, #tpu.memory_space<vmem>>, vector<4x8xf32>
    %c0_34 = arith.constant 0 : index
    %c0_35 = arith.constant 0 : index
    %79 = vector.load %arg7[%c0_34, %c0_35] : memref<8x256xf32, #tpu.memory_space<vmem>>, vector<8x256xf32>
    %c0_36 = arith.constant 0 : index
    %c0_37 = arith.constant 0 : index
    %80 = vector.load %arg8[%c0_36, %c0_37] : memref<32x8xf32, #tpu.memory_space<vmem>>, vector<32x8xf32>
    %81 = tpu.iota {dimensions = array<i32: 0>} : vector<32x256xi32>
    %82 = tpu.iota {dimensions = array<i32: 1>} : vector<32x256xi32>
    %c8_i32 = arith.constant 8 : i32
    %83 = vector.broadcast %c8_i32 : i32 to vector<32x256xi32>
    %84 = arith.muli %81, %83 : vector<32x256xi32>
    %85 = arith.cmpi sge, %82, %84 : vector<32x256xi32>
    %c8_i32_38 = arith.constant 8 : i32
    %86 = vector.broadcast %c8_i32_38 : i32 to vector<32x256xi32>
    %87 = arith.addi %84, %86 : vector<32x256xi32>
    %88 = arith.cmpi slt, %82, %87 : vector<32x256xi32>
    %89 = arith.andi %85, %88 : vector<32x256xi1>
    %90 = arith.extui %89 : vector<32x256xi1> to vector<32x256xi32>
    %91 = arith.sitofp %90 : vector<32x256xi32> to vector<32x256xf32>
    %92 = tpu.iota {dimensions = array<i32: 0>} : vector<256x8xi32>
    %93 = tpu.iota {dimensions = array<i32: 1>} : vector<256x8xi32>
    %94 = arith.cmpi eq, %92, %93 : vector<256x8xi32>
    %c8_i32_39 = arith.constant 8 : i32
    %95 = vector.broadcast %c8_i32_39 : i32 to vector<256x8xi32>
    %96 = arith.addi %93, %95 : vector<256x8xi32>
    %97 = arith.cmpi eq, %92, %96 : vector<256x8xi32>
    %98 = arith.ori %94, %97 : vector<256x8xi1>
    %c16_i32 = arith.constant 16 : i32
    %99 = vector.broadcast %c16_i32 : i32 to vector<256x8xi32>
    %100 = arith.addi %93, %99 : vector<256x8xi32>
    %101 = arith.cmpi eq, %92, %100 : vector<256x8xi32>
    %102 = arith.ori %98, %101 : vector<256x8xi1>
    %c24_i32 = arith.constant 24 : i32
    %103 = vector.broadcast %c24_i32 : i32 to vector<256x8xi32>
    %104 = arith.addi %93, %103 : vector<256x8xi32>
    %105 = arith.cmpi eq, %92, %104 : vector<256x8xi32>
    %106 = arith.ori %102, %105 : vector<256x8xi1>
    %c32_i32_40 = arith.constant 32 : i32
    %107 = vector.broadcast %c32_i32_40 : i32 to vector<256x8xi32>
    %108 = arith.addi %93, %107 : vector<256x8xi32>
    %109 = arith.cmpi eq, %92, %108 : vector<256x8xi32>
    %110 = arith.ori %106, %109 : vector<256x8xi1>
    %c40_i32 = arith.constant 40 : i32
    %111 = vector.broadcast %c40_i32 : i32 to vector<256x8xi32>
    %112 = arith.addi %93, %111 : vector<256x8xi32>
    %113 = arith.cmpi eq, %92, %112 : vector<256x8xi32>
    %114 = arith.ori %110, %113 : vector<256x8xi1>
    %c48_i32 = arith.constant 48 : i32
    %115 = vector.broadcast %c48_i32 : i32 to vector<256x8xi32>
    %116 = arith.addi %93, %115 : vector<256x8xi32>
    %117 = arith.cmpi eq, %92, %116 : vector<256x8xi32>
    %118 = arith.ori %114, %117 : vector<256x8xi1>
    %c56_i32 = arith.constant 56 : i32
    %119 = vector.broadcast %c56_i32 : i32 to vector<256x8xi32>
    %120 = arith.addi %93, %119 : vector<256x8xi32>
    %121 = arith.cmpi eq, %92, %120 : vector<256x8xi32>
    %122 = arith.ori %118, %121 : vector<256x8xi1>
    %c64_i32_41 = arith.constant 64 : i32
    %123 = vector.broadcast %c64_i32_41 : i32 to vector<256x8xi32>
    %124 = arith.addi %93, %123 : vector<256x8xi32>
    %125 = arith.cmpi eq, %92, %124 : vector<256x8xi32>
    %126 = arith.ori %122, %125 : vector<256x8xi1>
    %c72_i32 = arith.constant 72 : i32
    %127 = vector.broadcast %c72_i32 : i32 to vector<256x8xi32>
    %128 = arith.addi %93, %127 : vector<256x8xi32>
    %129 = arith.cmpi eq, %92, %128 : vector<256x8xi32>
    %130 = arith.ori %126, %129 : vector<256x8xi1>
    %c80_i32 = arith.constant 80 : i32
    %131 = vector.broadcast %c80_i32 : i32 to vector<256x8xi32>
    %132 = arith.addi %93, %131 : vector<256x8xi32>
    %133 = arith.cmpi eq, %92, %132 : vector<256x8xi32>
    %134 = arith.ori %130, %133 : vector<256x8xi1>
    %c88_i32 = arith.constant 88 : i32
    %135 = vector.broadcast %c88_i32 : i32 to vector<256x8xi32>
    %136 = arith.addi %93, %135 : vector<256x8xi32>
    %137 = arith.cmpi eq, %92, %136 : vector<256x8xi32>
    %138 = arith.ori %134, %137 : vector<256x8xi1>
    %c96_i32_42 = arith.constant 96 : i32
    %139 = vector.broadcast %c96_i32_42 : i32 to vector<256x8xi32>
    %140 = arith.addi %93, %139 : vector<256x8xi32>
    %141 = arith.cmpi eq, %92, %140 : vector<256x8xi32>
    %142 = arith.ori %138, %141 : vector<256x8xi1>
    %c104_i32 = arith.constant 104 : i32
    %143 = vector.broadcast %c104_i32 : i32 to vector<256x8xi32>
    %144 = arith.addi %93, %143 : vector<256x8xi32>
    %145 = arith.cmpi eq, %92, %144 : vector<256x8xi32>
    %146 = arith.ori %142, %145 : vector<256x8xi1>
    %c112_i32 = arith.constant 112 : i32
    %147 = vector.broadcast %c112_i32 : i32 to vector<256x8xi32>
    %148 = arith.addi %93, %147 : vector<256x8xi32>
    %149 = arith.cmpi eq, %92, %148 : vector<256x8xi32>
    %150 = arith.ori %146, %149 : vector<256x8xi1>
    %c120_i32 = arith.constant 120 : i32
    %151 = vector.broadcast %c120_i32 : i32 to vector<256x8xi32>
    %152 = arith.addi %93, %151 : vector<256x8xi32>
    %153 = arith.cmpi eq, %92, %152 : vector<256x8xi32>
    %154 = arith.ori %150, %153 : vector<256x8xi1>
    %c128_i32 = arith.constant 128 : i32
    %155 = vector.broadcast %c128_i32 : i32 to vector<256x8xi32>
    %156 = arith.addi %93, %155 : vector<256x8xi32>
    %157 = arith.cmpi eq, %92, %156 : vector<256x8xi32>
    %158 = arith.ori %154, %157 : vector<256x8xi1>
    %c136_i32 = arith.constant 136 : i32
    %159 = vector.broadcast %c136_i32 : i32 to vector<256x8xi32>
    %160 = arith.addi %93, %159 : vector<256x8xi32>
    %161 = arith.cmpi eq, %92, %160 : vector<256x8xi32>
    %162 = arith.ori %158, %161 : vector<256x8xi1>
    %c144_i32 = arith.constant 144 : i32
    %163 = vector.broadcast %c144_i32 : i32 to vector<256x8xi32>
    %164 = arith.addi %93, %163 : vector<256x8xi32>
    %165 = arith.cmpi eq, %92, %164 : vector<256x8xi32>
    %166 = arith.ori %162, %165 : vector<256x8xi1>
    %c152_i32 = arith.constant 152 : i32
    %167 = vector.broadcast %c152_i32 : i32 to vector<256x8xi32>
    %168 = arith.addi %93, %167 : vector<256x8xi32>
    %169 = arith.cmpi eq, %92, %168 : vector<256x8xi32>
    %170 = arith.ori %166, %169 : vector<256x8xi1>
    %c160_i32 = arith.constant 160 : i32
    %171 = vector.broadcast %c160_i32 : i32 to vector<256x8xi32>
    %172 = arith.addi %93, %171 : vector<256x8xi32>
    %173 = arith.cmpi eq, %92, %172 : vector<256x8xi32>
    %174 = arith.ori %170, %173 : vector<256x8xi1>
    %c168_i32 = arith.constant 168 : i32
    %175 = vector.broadcast %c168_i32 : i32 to vector<256x8xi32>
    %176 = arith.addi %93, %175 : vector<256x8xi32>
    %177 = arith.cmpi eq, %92, %176 : vector<256x8xi32>
    %178 = arith.ori %174, %177 : vector<256x8xi1>
    %c176_i32 = arith.constant 176 : i32
    %179 = vector.broadcast %c176_i32 : i32 to vector<256x8xi32>
    %180 = arith.addi %93, %179 : vector<256x8xi32>
    %181 = arith.cmpi eq, %92, %180 : vector<256x8xi32>
    %182 = arith.ori %178, %181 : vector<256x8xi1>
    %c184_i32 = arith.constant 184 : i32
    %183 = vector.broadcast %c184_i32 : i32 to vector<256x8xi32>
    %184 = arith.addi %93, %183 : vector<256x8xi32>
    %185 = arith.cmpi eq, %92, %184 : vector<256x8xi32>
    %186 = arith.ori %182, %185 : vector<256x8xi1>
    %c192_i32 = arith.constant 192 : i32
    %187 = vector.broadcast %c192_i32 : i32 to vector<256x8xi32>
    %188 = arith.addi %93, %187 : vector<256x8xi32>
    %189 = arith.cmpi eq, %92, %188 : vector<256x8xi32>
    %190 = arith.ori %186, %189 : vector<256x8xi1>
    %c200_i32 = arith.constant 200 : i32
    %191 = vector.broadcast %c200_i32 : i32 to vector<256x8xi32>
    %192 = arith.addi %93, %191 : vector<256x8xi32>
    %193 = arith.cmpi eq, %92, %192 : vector<256x8xi32>
    %194 = arith.ori %190, %193 : vector<256x8xi1>
    %c208_i32 = arith.constant 208 : i32
    %195 = vector.broadcast %c208_i32 : i32 to vector<256x8xi32>
    %196 = arith.addi %93, %195 : vector<256x8xi32>
    %197 = arith.cmpi eq, %92, %196 : vector<256x8xi32>
    %198 = arith.ori %194, %197 : vector<256x8xi1>
    %c216_i32 = arith.constant 216 : i32
    %199 = vector.broadcast %c216_i32 : i32 to vector<256x8xi32>
    %200 = arith.addi %93, %199 : vector<256x8xi32>
    %201 = arith.cmpi eq, %92, %200 : vector<256x8xi32>
    %202 = arith.ori %198, %201 : vector<256x8xi1>
    %c224_i32 = arith.constant 224 : i32
    %203 = vector.broadcast %c224_i32 : i32 to vector<256x8xi32>
    %204 = arith.addi %93, %203 : vector<256x8xi32>
    %205 = arith.cmpi eq, %92, %204 : vector<256x8xi32>
    %206 = arith.ori %202, %205 : vector<256x8xi1>
    %c232_i32 = arith.constant 232 : i32
    %207 = vector.broadcast %c232_i32 : i32 to vector<256x8xi32>
    %208 = arith.addi %93, %207 : vector<256x8xi32>
    %209 = arith.cmpi eq, %92, %208 : vector<256x8xi32>
    %210 = arith.ori %206, %209 : vector<256x8xi1>
    %c240_i32 = arith.constant 240 : i32
    %211 = vector.broadcast %c240_i32 : i32 to vector<256x8xi32>
    %212 = arith.addi %93, %211 : vector<256x8xi32>
    %213 = arith.cmpi eq, %92, %212 : vector<256x8xi32>
    %214 = arith.ori %210, %213 : vector<256x8xi1>
    %c248_i32 = arith.constant 248 : i32
    %215 = vector.broadcast %c248_i32 : i32 to vector<256x8xi32>
    %216 = arith.addi %93, %215 : vector<256x8xi32>
    %217 = arith.cmpi eq, %92, %216 : vector<256x8xi32>
    %218 = arith.ori %214, %217 : vector<256x8xi1>
    %219 = arith.extui %218 : vector<256x8xi1> to vector<256x8xi32>
    %220 = arith.sitofp %219 : vector<256x8xi32> to vector<256x8xf32>
    %cst_43 = arith.constant dense<0.000000e+00> : vector<32x8xf32>
    %221 = tpu.matmul %1, %78, %cst_43 {dimension_numbers = #tpu.dot_dimension_numbers<[1], [0], [0], [1], [0, 0, 1, 1], [], []>} : vector<32x4xf32>, vector<4x8xf32>, vector<32x8xf32> -> vector<32x8xf32>
    %222 = vector.broadcast %16 : vector<1x8xf32> to vector<32x8xf32>
    %223 = arith.addf %221, %222 : vector<32x8xf32>
    %cst_44 = arith.constant 0.000000e+00 : f32
    %224 = vector.broadcast %cst_44 : f32 to vector<32x8xf32>
    %225 = arith.maximumf %223, %224 : vector<32x8xf32>
    %cst_45 = arith.constant dense<0.000000e+00> : vector<32x256xf32>
    %226 = tpu.matmul %225, %79, %cst_45 {dimension_numbers = #tpu.dot_dimension_numbers<[1], [0], [0], [1], [0, 0, 1, 1], [], []>} : vector<32x8xf32>, vector<8x256xf32>, vector<32x256xf32> -> vector<32x256xf32>
    %227 = vector.broadcast %17 : vector<1x256xf32> to vector<32x256xf32>
    %228 = arith.addf %226, %227 : vector<32x256xf32>
    %cst_46 = arith.constant dense<0.000000e+00> : vector<32x32xf32>
    %229 = tpu.matmul %8, %77, %cst_46 {dimension_numbers = #tpu.dot_dimension_numbers<[1], [0], [0], [1], [0, 0, 1, 1], [], []>} : vector<32x16xf32>, vector<16x32xf32>, vector<32x32xf32> -> vector<32x32xf32>
    %cst_47 = arith.constant dense<0.000000e+00> : vector<32x256xf32>
    %230 = tpu.matmul %229, %91, %cst_47 {dimension_numbers = #tpu.dot_dimension_numbers<[1], [0], [0], [1], [0, 0, 1, 1], [], []>} : vector<32x32xf32>, vector<32x256xf32>, vector<32x256xf32> -> vector<32x256xf32>
    %231 = arith.mulf %230, %228 : vector<32x256xf32>
    %cst_48 = arith.constant dense<0.000000e+00> : vector<32x8xf32>
    %232 = tpu.matmul %231, %220, %cst_48 {dimension_numbers = #tpu.dot_dimension_numbers<[1], [0], [0], [1], [0, 0, 1, 1], [], []>} : vector<32x256xf32>, vector<256x8xf32>, vector<32x8xf32> -> vector<32x8xf32>
    %cst_49 = arith.constant dense<0.000000e+00> : vector<16x8xf32>
    %233 = tpu.matmul %12, %232, %cst_49 {dimension_numbers = #tpu.dot_dimension_numbers<[0], [0], [1], [1], [0, 1, 1, 1], [], []>} : vector<32x16xf32>, vector<32x8xf32>, vector<16x8xf32> -> vector<16x8xf32>
    %234 = vector.broadcast %69 : vector<16x1xf32> to vector<16x8xf32>
    %235 = arith.mulf %233, %234 : vector<16x8xf32>
    %cst_50 = arith.constant dense<0.000000e+00> : vector<16x8xf32>
    %236 = tpu.matmul %77, %80, %cst_50 {dimension_numbers = #tpu.dot_dimension_numbers<[1], [0], [0], [1], [0, 0, 1, 1], [], []>} : vector<16x32xf32>, vector<32x8xf32>, vector<16x8xf32> -> vector<16x8xf32>
    %237 = arith.addf %235, %236 : vector<16x8xf32>
    %238 = vector.broadcast %18 : vector<1x8xf32> to vector<16x8xf32>
    %239 = arith.addf %237, %238 : vector<16x8xf32>
    %c0_51 = arith.constant 0 : index
    %c0_52 = arith.constant 0 : index
    %240 = vector.load %arg10[%c0_51, %c0_52] : memref<16x8xf32, #tpu.memory_space<vmem>>, vector<16x8xf32>
    tpu.vector_store %arg10[%c0_51, %c0_52], %239 {strides = array<i32>} : memref<16x8xf32, #tpu.memory_space<vmem>>, vector<16x8xf32>,
    return
  }
}

</mosaic_0001>

<bundles_post_ra>
// kernel: tpu_custom_call.1
= control target key start
LH: loop header
LB: loop body
LE: loop exit
PB: predicated region body
PF: predicated region fallthrough
CT: control target
= control target key end

     0   :  { %vm4689_vm0 = vcmask 1043456   ;;  %vm4690_vm1 = vcmask 31744   ;;  %v3273_v2 = vmov 0   ;;  %vm339_vm2 = vcmask 1041408   ;;  %s4677_s3 = inlined_call_operand.vmem [shape: f32[4,2], index: 3, kind: input, shape index: {}]   ;;  %s4678_s1 = inlined_call_operand.vmem [shape: f32[32,4], index: 1, kind: input, shape index: {}]   ;;  %s4679_s2 = inlined_call_operand.vmem [shape: s32[32,2], index: 2, kind: input, shape index: {}]   ;;  %s4680_s4 = inlined_call_operand.vmem [shape: f32[2,128], index: 4, kind: input, shape index: {}]   ;;  %s4681_s0 = inlined_call_operand.vmem [shape: f32[16,4], index: 0, kind: input, shape index: {}]   ;;  %s4682_s9 = inlined_call_operand.vmem [shape: f32[6,256], index: 9, kind: input, shape index: {}]   ;;  %s4683_s5 = inlined_call_operand.vmem [shape: f32[4,32], index: 5, kind: input, shape index: {}]   ;;  %s4684_s6 = inlined_call_operand.vmem [shape: f32[4,8], index: 6, kind: input, shape index: {}]   ;;  %s4685_s7 = inlined_call_operand.vmem [shape: f32[8,256], index: 7, kind: input, shape index: {}]   ;;  %s4686_s8 = inlined_call_operand.vmem [shape: f32[32,8], index: 8, kind: input, shape index: {}]   ;;  %s4687_s10 = inlined_call_operand.vmem [shape: f32[16,8], index: 10, kind: output, shape index: {}]  }
   0x1   :  { %v102_v0 = vld [vmem:[%s4677_s3] sm:$0xf]  ;;  %3262 = vset.pattern.permute.xlu0 %v3273_v2  ;;  %3263 = vset.pattern.permute.xlu1 %v3273_v2  ;;  %v3353_v4 = vld [vmem:[%s4679_s2 + $0x10] sm:$0xff]  ;;  %v3359_v5 = vld [vmem:[%s4678_s1 + $0x8] sm:$0xff]  ;;  %vm326_vm3 = vcmask 15360   ;;  %v45_v23 = vlaneseq  ;;  %v4707_v29 = vmov 0.0  }
   0x2   :  { %v3339_v1 = vld [vmem:[%s4678_s1] sm:$0xff]  ;;  %3119 = vmatpush.msk.msra.mxu0 %vm4689_vm0, %v102_v0  ;;  %54 = vperm.xlu1 %3263, %v3353_v4   ;;  %v3364_v6 = vld [vmem:[%s4679_s2 + $0x8] sm:$0xff]  ;;  %v3369_v7 = vld [vmem:[%s4679_s2 + $0x18] sm:$0xff]  ;;  %vm4688_vm5 = vcmask 130048   ;;  %v3275_v44 = vmov 1   ;;  %v4699_v53 = vmov 1.0  }
   0x3   :  { %v3345_v3 = vld [vmem:[%s4679_s2] sm:$0xff]  ;;  %3120 = vmatmul.msk.f32.vlgmr.msra.gmra.mxu0 %vm4690_vm1, %v3339_v1  ;;  %v3378_v8 = vld [vmem:[%s4678_s1 + $0x10] sm:$0xff]  ;;  %v3385_v9 = vld [vmem:[%s4678_s1 + $0x18] sm:$0xff]  ;;  %v3410_v27 = vand.u32 127, %v45_v23  ;;  %v3437_v37 = vshrl.u32 %v45_v23, 7  ;;  %3264 = vset.pattern.permute.xlu2 %v3275_v44  ;;  %v4724_v60 = vmov 0 }
   0x4   :  { %48 = vperm.xlu0 %3262, %v3345_v3   ;;  %v103_v10 = vld [vmem:[%s4680_s4] sm:$0x3]  ;;  %v3395_v11 = vld [vmem:[%s4681_s0 + $0x8] sm:$0xff]  ;;  %72 = vperm.xlu2 %3264, %v3345_v3   ;;  %v4726_v0 = vmov 0  ;;  %v4728_v3 = vmov 0  ;;  %v4747_v23 = vmov 0 }
   0x5   :  { %3124 = vmatpush.msk.msra.mxu1 %vm339_vm2, %v103_v10  ;;  %3240 = vmatpush.msk.msra.mxu2 %vm339_vm2, %v103_v10  ;;  %v3400_v12 = vld [vmem:[%s4681_s0] sm:$0xff]  ;;  %v107_v38 = vmul.u32 32, %v3437_v37  ;;  %v3447_v42 = vadd.s32 120, %v3437_v37  ;;  %v3450_v43 = vadd.s32 32, %v3410_v27  ;;  %v3453_v45 = vadd.s32 64, %v3410_v27 }
   0x6   :  { %v95_v13 = vld [vmem:[%s4682_s9] ss:$0 sm:$0xff]  ;;  %v3456_v46 = vadd.s32 96, %v3410_v27  ;;  %v3459_v47 = vadd.s32 8, %v3410_v27  ;;  %v3468_v48 = vadd.s32 16, %v3410_v27  ;;  %v3471_v49 = vadd.s32 24, %v3410_v27 }
   0x7   :  { %399 = vmatpush.msrb.mxu2 %v3395_v11  ;;  %v109_v39 = vadd.s32 32, %v107_v38  ;;  %vm108_vm9 = vcmp.ge.s32.totalorder %v3410_v27, %v107_v38  ;;  %vm144_vm12 = vcmp.eq.s32.totalorder %v3447_v42, %v3410_v27  ;;  %vm161_vm13 = vcmp.eq.s32.totalorder %v3447_v42, %v3450_v43 }
   0x8   :  { %4722 = vst [vmem:[#allocation2_spill] sm:$0xff] %v3468_v48  ;;  %vm177_vm14 = vmor %vm144_vm12, %vm161_vm13  ;;  %vm194_vm15 = vcmp.eq.s32.totalorder %v3447_v42, %v3453_v45  ;;  %vm227_vm2 = vcmp.eq.s32.totalorder %v3447_v42, %v3456_v46  ;;  %v3486_v50 = vadd.s32 40, %v3410_v27  ;;  %v3495_v51 = vadd.s32 48, %v3410_v27 }
   0x9   :  { %400 = vmatpush.msrb.mxu2 %v3400_v12  ;;  %vm110_vm10 = vcmp.lt.s32.totalorder %v3410_v27, %v109_v39  ;;  %4723 = vst [vmem:[#allocation3_spill] sm:$0xff] %v3471_v49  ;;  %v3503_v52 = vadd.s32 56, %v3410_v27  ;;  %v3513_v55 = vadd.s32 72, %v3410_v27  ;;  %v3525_v56 = vadd.s32 80, %v3410_v27 }
   0xa   :  { %57 = vperm.xlu1 %3263, %v3369_v7   ;;  %vm111_vm11 = vmand %vm108_vm9, %vm110_vm10  ;;  %v3530_v57 = vadd.s32 88, %v3410_v27  ;;  %v3535_v58 = vadd.s32 112, %v3437_v37  ;;  %v3588_v62 = vadd.s32 104, %v3437_v37  ;;  %v3635_v2 = vadd.s32 96, %v3437_v37 }
   0xb   :  { %3121 = vmatmul.msk.f32.gmra.mxu0 %vm4690_vm1, %v3359_v5  ;;  %v3102_v40 = vsel %vm111_vm11, 1.0, %v4707_v29  ;;  %vm984_vm11 = vcmp.eq.s32.totalorder %v3447_v42, %v3486_v50  ;;  %v4734_v10 = vmov 0 }
   0xc   :  { %51 = vperm.xlu0 %3262, %v3364_v6   ;;  %3133 = vmatpush.msk.msra.mxu3 %vm4689_vm0, %v3102_v40  ;;  %vm1048_vm0 = vcmp.eq.s32.totalorder %v3535_v58, %v3495_v51 }
   0xd   :  { %75 = vperm.xlu2 %3264, %v3364_v6   ;;  %v4731_v6 = vmov 0 }
  0x12   :  { %3266 = vset.pattern.permute.xlu1 %v3275_v44 }
  0x13   :  { %3122 = vmatmul.msk.f32.gmra.mxu0 %vm4690_vm1, %v3378_v8  ;;  %81 = vperm.xlu1 %3266, %v3369_v7   ;;  %v3715_v7 = vadd.s32 80, %v3437_v37 }
  0x14   :  { %3265 = vset.pattern.permute.xlu0 %v3275_v44 }
  0x15   :  { %78 = vperm.xlu0 %3265, %v3353_v4   ;;  %v3677_v4 = vadd.s32 88, %v3437_v37 }
  0x1b   :  { %3123 = vmatmul.msk.f32.gmra.mxu0 %vm4690_vm1, %v3385_v9 }
  0x74   :  { %v55_v33 = vpop.permute.xlu1 %54 }
  0x75   :  { %vm61_vm7 = vcmp.eq.s32.totalorder %v3410_v27, %v55_v33 }
  0x76   :  { %v49_v28 = vpop.permute.xlu0 %48  ;;  %v3427_v34 = vsel %vm61_vm7, 1.0, %v4707_v29 }
  0x77   :  { %vm59_vm4 = vcmp.eq.s32.totalorder %v3410_v27, %v49_v28  ;;  %v73_v28 = vpop.permute.xlu2 %72 }
  0x78   :  { %v3415_v30 = vsel %vm59_vm4, 1.0, %v4707_v29  ;;  %vm210_vm4 = vmor %vm177_vm14, %vm194_vm15 }
  0x79   :  { %vm243_vm7 = vmor %vm210_vm4, %vm227_vm2  ;;  %vm1049_vm4 = vcmp.eq.s32.totalorder %v3447_v42, %v3495_v51 }
  0x7a   :  { %3138 = vmatpush.msk.msrb.mxu0 %vm243_vm7, %v4699_v53  ;;  %3241 = vmatpush.msk.msrb.mxu3 %vm243_vm7, %v4699_v53 }
  0x7c   :  { %v58_v35 = vpop.permute.xlu1 %57 }
  0x7d   :  { %vm62_vm8 = vcmp.eq.s32.totalorder %v3410_v27, %v58_v35 }
  0x7e   :  { %v52_v31 = vpop.permute.xlu0 %51  ;;  %v3433_v36 = vsel %vm62_vm8, 1.0, %v4707_v29  ;;  %vm871_vm8 = vcmp.eq.s32.totalorder %v3447_v42, %v3471_v49 }
  0x7f   :  { %vm60_vm6 = vcmp.eq.s32.totalorder %v3410_v27, %v52_v31  ;;  %v76_v33 = vpop.permute.xlu2 %75 }
  0x80   :  { %v310_v14 = vpop.f32.mrf.mxu0  ;;  %v3421_v32 = vsel %vm60_vm6, 1.0, %v4707_v29  ;;  %vm806_vm6 = vcmp.eq.s32.totalorder %v3447_v42, %v3468_v48 }
  0x81   :  { %v311_v15 = vadd.f32 %v310_v14, %v95_v13  ;;  %v4737_v14 = vmov 0 }
  0x83   :  { %v322_v16 = vmax.f32 %v311_v15, 0.0  ;;  %v3785_v15 = vadd.s32 64, %v3437_v37 }
  0x85   :  { %3125 = vmatmul.msk.f32.vlgmr.msra.gmra.mxu1 %vm326_vm3, %v322_v16  ;;  %v4739_v16 = vmov 0  ;;  %v82_v44 = vpop.permute.xlu1 %81 }
  0x87   :  { %v79_v39 = vpop.permute.xlu0 %78 }
  0x88   :  { %v313_v17 = vpop.f32.mrf.mxu0 }
  0x89   :  { %v314_v18 = vadd.f32 %v313_v17, %v95_v13  ;;  %v3810_v17 = vadd.s32 56, %v3437_v37 }
  0x8b   :  { %v323_v19 = vmax.f32 %v314_v18, 0.0  ;;  %v3831_v18 = vadd.s32 48, %v3437_v37 }
  0x8d   :  { %3126 = vmatmul.msk.f32.gmra.mxu1 %vm326_vm3, %v323_v19  ;;  %v4742_v19 = vmov 0 }
  0x90   :  { %v316_v20 = vpop.f32.mrf.mxu0 }
  0x91   :  { %v317_v21 = vadd.f32 %v316_v20, %v95_v13  ;;  %v3856_v20 = vadd.s32 40, %v3437_v37 }
  0x93   :  { %v324_v22 = vmax.f32 %v317_v21, 0.0  ;;  %v4744_v21 = vmov 0 }
  0x95   :  { %3127 = vmatmul.msk.f32.gmra.mxu1 %vm326_vm3, %v324_v22  ;;  %v3874_v22 = vadd.s32 32, %v3437_v37 }
  0x97   :  { %4746 = vst [vmem:[#allocation4_spill] sm:$0xff] %v3874_v22 }
  0x98   :  { %v319_v24 = vpop.f32.mrf.mxu0 }
  0x99   :  { %v320_v25 = vadd.f32 %v319_v24, %v95_v13  ;;  %v3754_v13 = vadd.s32 72, %v3437_v37  ;;  %v3889_v24 = vadd.s32 24, %v3437_v37 }
  0x9b   :  { %v325_v26 = vmax.f32 %v320_v25, 0.0  ;;  %v3903_v25 = vadd.s32 16, %v3437_v37 }
  0x9d   :  { %3128 = vmatmul.msk.f32.vlgmr.msra.gmra.mxu2 %vm326_vm3, %v325_v26  ;;  %vm741_vm3 = vcmp.eq.s32.totalorder %v3447_v42, %v3459_v47  ;;  %v3916_v26 = vadd.s32 8, %v3437_v37 }
  0x9e   :  { %vm773_vm9 = vmor %vm144_vm12, %vm741_vm3  ;;  %vm1114_vm3 = vcmp.eq.s32.totalorder %v3447_v42, %v3503_v52 }
  0x9f   :  { %vm838_vm10 = vmor %vm773_vm9, %vm806_vm6 }
  0xa0   :  { %vm903_vm14 = vmor %vm838_vm10, %vm871_vm8  ;;  %vm1227_vm8 = vcmp.eq.s32.totalorder %v3447_v42, %v3513_v55 }
  0xa1   :  { %vm951_vm12 = vmor %vm903_vm14, %vm161_vm13  ;;  %vm1292_vm13 = vcmp.eq.s32.totalorder %v3447_v42, %v3525_v56 }
  0xa2   :  { %vm1016_vm6 = vmor %vm951_vm12, %vm984_vm11  ;;  %vm1357_vm11 = vcmp.eq.s32.totalorder %v3447_v42, %v3530_v57 }
  0xa3   :  { %vm1081_vm7 = vmor %vm1016_vm6, %vm1049_vm4  ;;  %vm160_vm6 = vcmp.eq.s32.totalorder %v3535_v58, %v3450_v43 }
  0xa4   :  { %vm1146_vm9 = vmor %vm1081_vm7, %vm1114_vm3  ;;  %vm143_vm3 = vcmp.eq.s32.totalorder %v3535_v58, %v3410_v27 }
  0xa5   :  { %3129 = vmatmul.msk.f32.vlgmr.msrb.gmra.mxu2 %vm4688_vm5, %v3415_v30  ;;  %vm1194_vm10 = vmor %vm1146_vm9, %vm194_vm15  ;;  %vm193_vm15 = vcmp.eq.s32.totalorder %v3535_v58, %v3453_v45 }
  0xa6   :  { %vm1259_vm14 = vmor %vm1194_vm10, %vm1227_vm8  ;;  %vm226_vm8 = vcmp.eq.s32.totalorder %v3535_v58, %v3456_v46  ;;  %vm805_vm10 = vcmp.eq.s32.totalorder %v3535_v58, %v3468_v48 }
  0xa7   :  { %vm1324_vm4 = vmor %vm1259_vm14, %vm1292_vm13  ;;  %vm740_vm13 = vcmp.eq.s32.totalorder %v3535_v58, %v3459_v47  ;;  %vm870_vm14 = vcmp.eq.s32.totalorder %v3535_v58, %v3471_v49 }
  0xa8   :  { %vm1389_vm12 = vmor %vm1324_vm4, %vm1357_vm11 }
  0xa9   :  { %vm3550_vm7 = vmor %vm1389_vm12, %vm227_vm2 }
  0xaa   :  { %v4725_v60 = vsel %vm3550_vm7, 4294967295, %v4724_v60  ;;  %vm176_vm9 = vmor %vm143_vm3, %vm160_vm6 }
  0xab   :  { %vm209_vm2 = vmor %vm176_vm9, %vm193_vm15  ;;  %vm983_vm9 = vcmp.eq.s32.totalorder %v3535_v58, %v3486_v50 }
  0xac   :  { %vm242_vm11 = vmor %vm209_vm2, %vm226_vm8 }
  0xad   :  { %3130 = vmatmul.msk.f32.gmra.mxu2 %vm4688_vm5, %v3421_v32  ;;  %3139 = vmatpush.msk.msrb.mxu0 %vm242_vm11, %v4699_v53  ;;  %vm772_vm4 = vmor %vm143_vm3, %vm740_vm13  ;;  %vm1113_vm3 = vcmp.eq.s32.totalorder %v3535_v58, %v3503_v52 }
  0xae   :  { %3242 = vmatpush.msk.msrb.mxu3 %vm242_vm11, %v4699_v53  ;;  %vm837_vm12 = vmor %vm772_vm4, %vm805_vm10  ;;  %vm1226_vm10 = vcmp.eq.s32.totalorder %v3535_v58, %v3513_v55 }
  0xb5   :  { %3131 = vmatmul.msk.f32.gmra.mxu2 %vm4688_vm5, %v3427_v34 }
  0xbd   :  { %3132 = vmatmul.msk.f32.gmra.mxu2 %vm4688_vm5, %v3433_v36  ;;  %vm902_vm5 = vmor %vm837_vm12, %vm870_vm14  ;;  %vm1291_vm14 = vcmp.eq.s32.totalorder %v3535_v58, %v3525_v56 }
  0xbe   :  { %vm950_vm2 = vmor %vm902_vm5, %vm160_vm6  ;;  %vm1356_vm5 = vcmp.eq.s32.totalorder %v3535_v58, %v3530_v57 }
  0xbf   :  { %vm1015_vm13 = vmor %vm950_vm2, %vm983_vm9  ;;  %vm142_vm9 = vcmp.eq.s32.totalorder %v3588_v62, %v3410_v27  ;;  %vm159_vm2 = vcmp.eq.s32.totalorder %v3588_v62, %v3450_v43 }
  0xc0   :  { %vm1080_vm11 = vmor %vm1015_vm13, %vm1048_vm0  ;;  %vm192_vm13 = vcmp.eq.s32.totalorder %v3588_v62, %v3453_v45 }
  0xc1   :  { %vm1145_vm4 = vmor %vm1080_vm11, %vm1113_vm3  ;;  %vm4691_vm11 = vcmp.eq.s32.totalorder %v3588_v62, %v3456_v46 }
  0xc2   :  { %vm1193_vm12 = vmor %vm1145_vm4, %vm193_vm15  ;;  %vm739_vm4 = vcmp.eq.s32.totalorder %v3588_v62, %v3459_v47 }
  0xc3   :  { %vm1258_vm6 = vmor %vm1193_vm12, %vm1226_vm10 }
  0xc4   :  { %vm1323_vm0 = vmor %vm1258_vm6, %vm1291_vm14 }
  0xc5   :  { %vm1388_vm3 = vmor %vm1323_vm0, %vm1356_vm5  ;;  %vm869_vm5 = vcmp.eq.s32.totalorder %v3588_v62, %v3471_v49 }
  0xc6   :  { %vm3607_vm15 = vmor %vm1388_vm3, %vm226_vm8  ;;  %vm804_vm8 = vcmp.eq.s32.totalorder %v3588_v62, %v3468_v48  ;;  %vm982_vm3 = vcmp.eq.s32.totalorder %v3588_v62, %v3486_v50 }
  0xc7   :  { %v4727_v0 = vsel %vm3607_vm15, 4294967295, %v4726_v0  ;;  %vm175_vm10 = vmor %vm142_vm9, %vm159_vm2 }
  0xc8   :  { %vm208_vm14 = vmor %vm175_vm10, %vm192_vm13 }
  0xc9   :  { %vm241_vm12 = vmor %vm208_vm14, %vm4691_vm11  ;;  %vm981_vm11 = vcmp.eq.s32.totalorder %v3635_v2, %v3486_v50 }
  0xca   :  { %3140 = vmatpush.msk.msrb.mxu0 %vm241_vm12, %v4699_v53  ;;  %vm771_vm6 = vmor %vm142_vm9, %vm739_vm4  ;;  %3243 = vmatpush.msk.msrb.mxu3 %vm241_vm12, %v4699_v53  ;;  %vm1112_vm9 = vcmp.eq.s32.totalorder %v3588_v62, %v3503_v52 }
  0xcb   :  { %vm836_vm0 = vmor %vm771_vm6, %vm804_vm8  ;;  %vm141_vm6 = vcmp.eq.s32.totalorder %v3635_v2, %v3410_v27 }
  0xcc   :  { %vm901_vm10 = vmor %vm836_vm0, %vm869_vm5  ;;  %vm158_vm5 = vcmp.eq.s32.totalorder %v3635_v2, %v3450_v43 }
  0xcd   :  { %vm949_vm14 = vmor %vm901_vm10, %vm159_vm2  ;;  %vm4692_vm2 = vcmp.eq.s32.totalorder %v3635_v2, %v3453_v45  ;;  %vm738_vm10 = vcmp.eq.s32.totalorder %v3635_v2, %v3459_v47 }
  0xce   :  { %vm1014_vm4 = vmor %vm949_vm14, %vm982_vm3  ;;  %vm803_vm14 = vcmp.eq.s32.totalorder %v3635_v2, %v3468_v48 }
  0xcf   :  { %vm174_vm3 = vmor %vm141_vm6, %vm158_vm5 }
 0x102   :  { %v360_v38 = vpop.f32.mrf.mxu1 }
 0x120   :  { %v3444_v41 = vpop.f32.mrf.mxu2 }
 0x128   :  { %v402_v54 = vpop.f32.mrf.mxu2 }
 0x129   :  { %3134 = vmatmul.msk.f32.vlgmr.msra.gmra.mxu3 %vm4690_vm1, %v402_v54  ;;  %v96_v54 = vld [vmem:[%s4682_s9 + $0x1] ss:$0 sm:$0xff] }
 0x130   :  { %v405_v59 = vpop.f32.mrf.mxu2 }
 0x131   :  { %3135 = vmatmul.msk.f32.gmra.mxu3 %vm4690_vm1, %v405_v59  ;;  %v361_v59 = vadd.f32 %v360_v38, %v96_v54 }
 0x138   :  { %v408_v61 = vpop.f32.mrf.mxu2 }
 0x139   :  { %3136 = vmatmul.msk.f32.gmra.mxu3 %vm4690_vm1, %v408_v61 }
 0x140   :  { %v411_v63 = vpop.f32.mrf.mxu2 }
 0x141   :  { %3137 = vmatmul.msk.f32.gmra.mxu3 %vm4690_vm1, %v411_v63  ;;  %vm1047_vm1 = vcmp.eq.s32.totalorder %v3588_v62, %v3495_v51 }
 0x142   :  { %vm1079_vm12 = vmor %vm1014_vm4, %vm1047_vm1  ;;  %vm4693_vm1 = vcmp.eq.s32.totalorder %v3635_v2, %v3456_v46  ;;  %vm868_vm4 = vcmp.eq.s32.totalorder %v3635_v2, %v3471_v49 }
 0x143   :  { %vm1144_vm8 = vmor %vm1079_vm12, %vm1112_vm9 }
 0x144   :  { %vm3649_vm0 = vmor %vm1144_vm8, %vm192_vm13 }
 0x145   :  { %v4729_v3 = vsel %vm3649_vm0, 4294967295, %v4728_v3  ;;  %vm207_vm13 = vmor %vm174_vm3, %vm4692_vm2  ;;  %vm1046_vm2 = vcmp.eq.s32.totalorder %v3635_v2, %v3495_v51 }
 0x146   :  { %vm240_vm9 = vmor %vm207_vm13, %vm4693_vm1 }
 0x147   :  { %3141 = vmatpush.msk.msrb.mxu0 %vm240_vm9, %v4699_v53  ;;  %vm770_vm12 = vmor %vm141_vm6, %vm738_vm10  ;;  %3244 = vmatpush.msk.msrb.mxu3 %vm240_vm9, %v4699_v53  ;;  %vm1111_vm6 = vcmp.eq.s32.totalorder %v3635_v2, %v3503_v52 }
 0x148   :  { %vm835_vm8 = vmor %vm770_vm12, %vm803_vm14  ;;  %vm140_vm14 = vcmp.eq.s32.totalorder %v3677_v4, %v3410_v27  ;;  %vm157_vm12 = vcmp.eq.s32.totalorder %v3677_v4, %v3450_v43 }
 0x149   :  { %vm900_vm3 = vmor %vm835_vm8, %vm868_vm4  ;;  %vm4694_vm4 = vcmp.eq.s32.totalorder %v3677_v4, %v3453_v45  ;;  %vm4730_vm8 = vcmp.eq.s32.totalorder %v3635_v2, %v3453_v45 }
 0x14a   :  { %vm948_vm13 = vmor %vm900_vm3, %vm158_vm5 }
 0x14b   :  { %vm1013_vm10 = vmor %vm948_vm13, %vm981_vm11  ;;  %vm737_vm11 = vcmp.eq.s32.totalorder %v3677_v4, %v3459_v47 }
 0x14c   :  { %vm1078_vm9 = vmor %vm1013_vm10, %vm1046_vm2  ;;  %vm802_vm2 = vcmp.eq.s32.totalorder %v3677_v4, %v3468_v48  ;;  %vm980_vm10 = vcmp.eq.s32.totalorder %v3677_v4, %v3486_v50 }
 0x14d   :  { %vm1143_vm1 = vmor %vm1078_vm9, %vm1111_vm6 }
 0x14e   :  { %vm3695_vm0 = vmor %vm1143_vm1, %vm4730_vm8  ;;  %vm867_vm1 = vcmp.eq.s32.totalorder %v3677_v4, %v3471_v49  ;;  %vm1045_vm8 = vcmp.eq.s32.totalorder %v3677_v4, %v3495_v51 }
 0x14f   :  { %v4732_v6 = vsel %vm3695_vm0, 4294967295, %v4731_v6  ;;  %vm173_vm5 = vmor %vm140_vm14, %vm157_vm12 }
 0x150   :  { %vm206_vm3 = vmor %vm173_vm5, %vm4694_vm4  ;;  %vm156_vm4 = vcmp.eq.s32.totalorder %v3715_v7, %v3450_v43 }
 0x151   :  { %3142 = vmatpush.msk.msrb.mxu0 %vm206_vm3, %v4699_v53  ;;  %vm769_vm13 = vmor %vm140_vm14, %vm737_vm11  ;;  %3245 = vmatpush.msk.msrb.mxu3 %vm206_vm3, %v4699_v53  ;;  %vm1110_vm14 = vcmp.eq.s32.totalorder %v3677_v4, %v3503_v52 }
 0x152   :  { %vm834_vm6 = vmor %vm769_vm13, %vm802_vm2  ;;  %vm139_vm13 = vcmp.eq.s32.totalorder %v3715_v7, %v3410_v27 }
 0x153   :  { %vm899_vm9 = vmor %vm834_vm6, %vm867_vm1  ;;  %vm4695_vm1 = vcmp.eq.s32.totalorder %v3715_v7, %v3453_v45  ;;  %vm4733_vm6 = vcmp.eq.s32.totalorder %v3677_v4, %v3453_v45 }
 0x154   :  { %vm947_vm5 = vmor %vm899_vm9, %vm157_vm12  ;;  %vm736_vm12 = vcmp.eq.s32.totalorder %v3715_v7, %v3459_v47  ;;  %vm801_vm9 = vcmp.eq.s32.totalorder %v3715_v7, %v3468_v48 }
 0x155   :  { %vm1012_vm11 = vmor %vm947_vm5, %vm980_vm10  ;;  %vm866_vm5 = vcmp.eq.s32.totalorder %v3715_v7, %v3471_v49 }
 0x156   :  { %vm1077_vm2 = vmor %vm1012_vm11, %vm1045_vm8 }
 0x157   :  { %vm1142_vm3 = vmor %vm1077_vm2, %vm1110_vm14  ;;  %vm979_vm2 = vcmp.eq.s32.totalorder %v3715_v7, %v3486_v50 }
 0x158   :  { %vm3734_vm0 = vmor %vm1142_vm3, %vm4733_vm6  ;;  %vm1044_vm6 = vcmp.eq.s32.totalorder %v3715_v7, %v3495_v51 }
 0x159   :  { %v4735_v10 = vsel %vm3734_vm0, 4294967295, %v4734_v10  ;;  %vm172_vm10 = vmor %vm139_vm13, %vm156_vm4 }
 0x15a   :  { %vm205_vm8 = vmor %vm172_vm10, %vm4695_vm1  ;;  %vm155_vm1 = vcmp.eq.s32.totalorder %v3754_v13, %v3450_v43 }
 0x15b   :  { %3143 = vmatpush.msk.msrb.mxu0 %vm205_vm8, %v4699_v53  ;;  %vm768_vm14 = vmor %vm139_vm13, %vm736_vm12  ;;  %3246 = vmatpush.msk.msrb.mxu3 %vm205_vm8, %v4699_v53  ;;  %vm1109_vm13 = vcmp.eq.s32.totalorder %v3715_v7, %v3503_v52 }
 0x15c   :  { %vm833_vm11 = vmor %vm768_vm14, %vm801_vm9  ;;  %vm138_vm14 = vcmp.eq.s32.totalorder %v3754_v13, %v3410_v27 }
 0x15d   :  { %vm898_vm3 = vmor %vm833_vm11, %vm866_vm5  ;;  %vm4696_vm5 = vcmp.eq.s32.totalorder %v3754_v13, %v3453_v45  ;;  %vm4736_vm11 = vcmp.eq.s32.totalorder %v3715_v7, %v3453_v45 }
 0x15e   :  { %vm946_vm10 = vmor %vm898_vm3, %vm156_vm4  ;;  %vm735_vm4 = vcmp.eq.s32.totalorder %v3754_v13, %v3459_v47  ;;  %vm800_vm3 = vcmp.eq.s32.totalorder %v3754_v13, %v3468_v48 }
 0x15f   :  { %vm1011_vm12 = vmor %vm946_vm10, %vm979_vm2  ;;  %vm865_vm10 = vcmp.eq.s32.totalorder %v3754_v13, %v3471_v49 }
 0x160   :  { %vm1076_vm9 = vmor %vm1011_vm12, %vm1044_vm6 }
 0x161   :  { %vm1141_vm8 = vmor %vm1076_vm9, %vm1109_vm13 }
 0x162   :  { %vm3773_vm0 = vmor %vm1141_vm8, %vm4736_vm11  ;;  %vm137_vm8 = vcmp.eq.s32.totalorder %v3785_v15, %v3410_v27  ;;  %vm4697_vm11 = vcmp.eq.s32.totalorder %v3785_v15, %v3450_v43 }
 0x163   :  { %v4738_v14 = vsel %vm3773_vm0, 4294967295, %v4737_v14  ;;  %vm171_vm2 = vmor %vm138_vm14, %vm155_vm1 }
 0x164   :  { %vm204_vm6 = vmor %vm171_vm2, %vm4696_vm5  ;;  %vm153_vm5 = vcmp.eq.s32.totalorder %v3810_v17, %v3450_v43 }
 0x165   :  { %3144 = vmatpush.msk.msrb.mxu0 %vm204_vm6, %v4699_v53  ;;  %vm767_vm13 = vmor %vm138_vm14, %vm735_vm4  ;;  %3247 = vmatpush.msk.msrb.mxu3 %vm204_vm6, %v4699_v53  ;;  %vm4698_vm14 = vcmp.eq.s32.totalorder %v3785_v15, %v3453_v45  ;;  %vm734_vm4 = vcmp.eq.s32.totalorder %v3785_v15, %v3459_v47  ;;  %vm799_vm6 = vcmp.eq.s32.totalorder %v3785_v15, %v3468_v48 }
 0x166   :  { %vm832_vm12 = vmor %vm767_vm13, %vm800_vm3 }
 0x167   :  { %vm897_vm9 = vmor %vm832_vm12, %vm865_vm10  ;;  %vm864_vm10 = vcmp.eq.s32.totalorder %v3785_v15, %v3471_v49 }
 0x168   :  { %vm3801_vm2 = vmor %vm897_vm9, %vm155_vm1  ;;  %vm136_vm9 = vcmp.eq.s32.totalorder %v3810_v17, %v3410_v27 }
 0x169   :  { %v4740_v16 = vsel %vm3801_vm2, 4294967295, %v4739_v16  ;;  %vm170_vm3 = vmor %vm137_vm8, %vm4697_vm11  ;;  %vm733_vm2 = vcmp.eq.s32.totalorder %v3810_v17, %v3459_v47 }
 0x16a   :  { %vm203_vm1 = vmor %vm170_vm3, %vm4698_vm14  ;;  %vm4741_vm3 = vcmp.eq.s32.totalorder %v3785_v15, %v3450_v43  ;;  %vm732_vm14 = vcmp.eq.s32.totalorder %v3831_v18, %v3459_v47 }
 0x16b   :  { %3145 = vmatpush.msk.msrb.mxu0 %vm203_vm1, %v4699_v53  ;;  %vm766_vm13 = vmor %vm137_vm8, %vm734_vm4  ;;  %3248 = vmatpush.msk.msrb.mxu3 %vm203_vm1, %v4699_v53  ;;  %vm798_vm4 = vcmp.eq.s32.totalorder %v3810_v17, %v3468_v48  ;;  %vm863_vm1 = vcmp.eq.s32.totalorder %v3810_v17, %v3471_v49 }
 0x16c   :  { %vm831_vm12 = vmor %vm766_vm13, %vm799_vm6 }
 0x16d   :  { %vm896_vm11 = vmor %vm831_vm12, %vm864_vm10  ;;  %vm152_vm12 = vcmp.eq.s32.totalorder %v3831_v18, %v3450_v43 }
 0x16e   :  { %vm3836_vm8 = vmor %vm896_vm11, %vm4741_vm3  ;;  %vm135_vm11 = vcmp.eq.s32.totalorder %v3831_v18, %v3410_v27 }
 0x16f   :  { %v4743_v19 = vsel %vm3836_vm8, 4294967295, %v4742_v19  ;;  %vm169_vm6 = vmor %vm136_vm9, %vm153_vm5 }
 0x170   :  { %3146 = vmatpush.msk.msrb.mxu0 %vm169_vm6, %v4699_v53  ;;  %vm765_vm10 = vmor %vm136_vm9, %vm733_vm2  ;;  %3249 = vmatpush.msk.msrb.mxu3 %vm169_vm6, %v4699_v53  ;;  %vm797_vm9 = vcmp.eq.s32.totalorder %v3831_v18, %v3468_v48  ;;  %vm862_vm6 = vcmp.eq.s32.totalorder %v3831_v18, %v3471_v49 }
 0x171   :  { %vm830_vm13 = vmor %vm765_vm10, %vm798_vm4  ;;  %vm4717_vm10 = vcmp.eq.s32.totalorder %v3856_v20, %v3410_v27 }
 0x172   :  { %vm895_vm3 = vmor %vm830_vm13, %vm863_vm1  ;;  %vm4716_vm13 = vcmp.eq.s32.totalorder %v3856_v20, %v3450_v43 }
 0x173   :  { %vm3861_vm2 = vmor %vm895_vm3, %vm153_vm5 }
 0x174   :  { %v4745_v21 = vsel %vm3861_vm2, 4294967295, %v4744_v21  ;;  %vm168_vm4 = vmor %vm135_vm11, %vm152_vm12 }
 0x175   :  { %3147 = vmatpush.msk.msrb.mxu0 %vm168_vm4, %v4699_v53  ;;  %vm764_vm1 = vmor %vm135_vm11, %vm732_vm14  ;;  %3250 = vmatpush.msk.msrb.mxu3 %vm168_vm4, %v4699_v53  ;;  %vm4715_vm11 = vcmp.eq.s32.totalorder %v3874_v22, %v3410_v27  ;;  %vm4713_vm4 = vcmp.eq.s32.totalorder %v3889_v24, %v3410_v27 }
 0x176   :  { %vm829_vm5 = vmor %vm764_vm1, %vm797_vm9  ;;  %vm4714_vm9 = vcmp.eq.s32.totalorder %v3874_v22, %v3450_v43  ;;  %vm4711_vm1 = vcmp.eq.s32.totalorder %v3916_v26, %v3410_v27 }
 0x177   :  { %vm894_vm3 = vmor %vm829_vm5, %vm862_vm6  ;;  %vm4712_vm6 = vcmp.eq.s32.totalorder %v3903_v25, %v3410_v27  ;;  %vm4710_vm5 = vcmp.eq.s32.totalorder %v3437_v37, %v3410_v27 }
 0x178   :  { %vm3884_vm2 = vmor %vm894_vm3, %vm152_vm12  ;;  %vm83_vm3 = vcmp.eq.s32.totalorder %v3410_v27, %v73_v28 }
 0x179   :  { %v4748_v23 = vsel %vm3884_vm2, 4294967295, %v4747_v23  ;;  %vm167_vm14 = vmor %vm4717_vm10, %vm4716_vm13  ;;  %v3097_v31 = vsel %vm83_vm3, 1.0, %v4707_v29  ;;  %vm86_vm3 = vcmp.eq.s32.totalorder %v3410_v27, %v82_v44 }
 0x17a   :  { %4749 = vst [vmem:[#allocation5_spill] sm:$0xff] %v4748_v23  ;;  %3148 = vmatpush.msk.msrb.mxu0 %vm167_vm14, %v4699_v53  ;;  %3251 = vmatpush.msk.msrb.mxu3 %vm167_vm14, %v4699_v53  ;;  %vm166_vm12 = vmor %vm4715_vm11, %vm4714_vm9  ;;  %vm84_vm14 = vcmp.eq.s32.totalorder %v3410_v27, %v76_v33  ;;  %v3100_v28 = vsel %vm86_vm3, 1.0, %v4707_v29  ;;  %vm4751_vm3 = vcmask 31744  }
 0x17b   :  { %496 = vxpose.xlu2.b32.start [1/4] (short) (narrow) %v3097_v31, 16  ;;  %v3098_v35 = vsel %vm84_vm14, 1.0, %v4707_v29  ;;  %v363_v31 = vpop.f32.mrf.mxu1  ;;  %vm4718_vm14 = vcmask 261120  }
 0x17c   :  { %3149 = vmatpush.msk.msrb.mxu0 %vm166_vm12, %v4699_v53  ;;  %3252 = vmatpush.msk.msrb.mxu3 %vm166_vm12, %v4699_v53  ;;  %vm85_vm12 = vcmp.eq.s32.totalorder %v3410_v27, %v79_v39  ;;  %v364_v33 = vadd.f32 %v363_v31, %v96_v54 }
 0x17d   :  { %v3099_v40 = vsel %vm85_vm12, 1.0, %v4707_v29  ;;  %vm4750_vm12 = vcmask 1043456  }
 0x17e   :  { %3150 = vmatpush.msk.msrb.mxu0 %vm4713_vm4, %v4699_v53  ;;  %3253 = vmatpush.msk.msrb.mxu3 %vm4713_vm4, %v4699_v53 }
 0x180   :  { %3151 = vmatpush.msk.msrb.mxu0 %vm4712_vm6, %v4699_v53  ;;  %3254 = vmatpush.msk.msrb.mxu3 %vm4712_vm6, %v4699_v53  ;;  %vm4754_vm6 = vmmov %vm4751_vm3 }
 0x182   :  { %3152 = vmatpush.msk.msrb.mxu0 %vm4711_vm1, %v4699_v53  ;;  %3255 = vmatpush.msk.msrb.mxu3 %vm4711_vm1, %v4699_v53  ;;  %vm4753_vm1 = vmmov %vm4750_vm12 }
 0x183   :  { %497 = vxpose.xlu2.b32.cont [2/4] (short) (narrow) %v3098_v35, 16 }
 0x184   :  { %3153 = vmatpush.msk.msrb.mxu0 %vm4710_vm5, %v4699_v53  ;;  %3256 = vmatpush.msk.msrb.mxu3 %vm4710_vm5, %v4699_v53  ;;  %v366_v53 = vpop.f32.mrf.mxu1  ;;  %vm4752_vm5 = vmmov %vm4751_vm3 }
 0x185   :  { %v367_v22 = vadd.f32 %v366_v53, %v96_v54 }
 0x18b   :  { %498 = vxpose.xlu2.b32.cont [3/4] (short) (narrow) %v3099_v40, 16  ;;  %v370_v40 = vadd.f32 %v3444_v41, %v96_v54 }
 0x193   :  { %499 = vxpose.xlu2.b32.end [4/4] (short) (narrow) %v3100_v28, 16 }
 0x1ac   :  { %v446_v61 = vpop.f32.mrf.mxu3 }
 0x1ad   :  { %v458_v63 = vmul.f32 %v446_v61, %v361_v59 }
 0x1af   :  { %478 = vmatmul.f32.vlgmr.msrb.gmra.mxu0 %v458_v63 }
 0x1b4   :  { %v449_v35 = vpop.f32.mrf.mxu3 }
 0x1b5   :  { %v459_v39 = vmul.f32 %v449_v35, %v364_v33 }
 0x1b7   :  { %481 = vmatmul.f32.gmra.mxu0 %v459_v39 }
 0x1bc   :  { %v452_v49 = vpop.f32.mrf.mxu3 }
 0x1bd   :  { %v460_v48 = vmul.f32 %v452_v49, %v367_v22  ;;  %v3277_v22 = vmov 32  }
 0x1be   :  { %3268 = vset.pattern.permute.xlu0 %v3277_v22  ;;  %3267 = vset.pattern.permute.xlu1 %v3277_v22 }
 0x1bf   :  { %484 = vmatmul.f32.gmra.mxu0 %v460_v48 }
 0x1c4   :  { %v455_v44 = vpop.f32.mrf.mxu3 }
 0x1c5   :  { %v461_v38 = vmul.f32 %v455_v44, %v370_v40 }
 0x1c7   :  { %487 = vmatmul.f32.vlgmr.msrb.gmra.mxu3 %v461_v38 }
 0x214   :  { %v3971_v53 = vpop.trf.xlu2 }
 0x21c   :  { %v3977_v49 = vpop.trf.xlu2 }
 0x22c   :  { %v479_v59 = vpop.f32.mrf.mxu0 }
 0x22d   :  { %v492_v41 = vsel %vm4718_vm14, %v479_v59, 1.0 }
 0x234   :  { %v482_v61 = vpop.f32.mrf.mxu0 }
 0x235   :  { %v493_v48 = vsel %vm4718_vm14, %v482_v61, 1.0 }
 0x23c   :  { %v485_v29 = vpop.f32.mrf.mxu0 }
 0x23d   :  { %v494_v28 = vsel %vm4718_vm14, %v485_v29, 1.0  ;;  %v104_v29 = vld [vmem:[%s4683_s5] sm:$0xf] }
 0x23e   :  { %3156 = vmatpush.msk.msra.mxu3 %vm4750_vm12, %v104_v29  ;;  %vm4755_vm12 = vmmov %vm4751_vm3 }
 0x23f   :  { %3157 = vmatmul.msk.f32.vlgmr.msra.gmra.mxu3 %vm4751_vm3, %v3400_v12 }
 0x247   :  { %3158 = vmatmul.msk.f32.gmra.mxu3 %vm4752_vm5, %v3395_v11 }
 0x24a   :  { %v488_v23 = vpop.f32.mrf.mxu3 }
 0x24b   :  { %v495_v63 = vsel %vm4718_vm14, %v488_v23, 1.0  ;;  %v637_v23 = vld [vmem:[%s4684_s6] sm:$0xf] }
 0x24c   :  { %546 = vmatpush.msrb.mxu1 %v495_v63  ;;  %3199 = vmatpush.msk.msra.mxu2 %vm4753_vm1, %v637_v23  ;;  %vm4756_vm1 = vmmov %vm4751_vm3 }
 0x24d   :  { %3200 = vmatmul.msk.f32.vlgmr.msra.gmra.mxu2 %vm4754_vm6, %v3339_v1  ;;  %vm4757_vm9 = vmmov %vm4756_vm1 }
 0x24e   :  { %547 = vmatpush.msrb.mxu1 %v494_v28 }
 0x250   :  { %548 = vmatpush.msrb.mxu1 %v493_v48 }
 0x252   :  { %549 = vmatpush.msrb.mxu1 %v492_v41 }
 0x253   :  { %3154 = vmatmul.msk.f32.vlgmr.msrb.gmra.mxu1 %vm4718_vm14, %v3971_v53 }
 0x255   :  { %3201 = vmatmul.msk.f32.gmra.mxu2 %vm4755_vm12, %v3359_v5 }
 0x25b   :  { %3155 = vmatmul.msk.f32.gmra.mxu1 %vm4718_vm14, %v3977_v49 }
 0x25d   :  { %3202 = vmatmul.msk.f32.gmra.mxu2 %vm4756_vm1, %v3378_v8 }
 0x265   :  { %3203 = vmatmul.msk.f32.gmra.mxu2 %vm4757_vm9, %v3385_v9  ;;  %v97_v9 = vld [vmem:[%s4682_s9 + $0x2] ss:$0 sm:$0xff] }
 0x2d0   :  { %v551_v54 = vpop.f32.mrf.mxu1 }
 0x2d1   :  { %v557_v31 = vmax.f32 %v551_v54, 1.0 }
 0x2d3   :  { %3269 = vrcp.f32 %v557_v31  ;;  %v570_v40 = vand.u32 2147483648, %v557_v31  ;;  %v568_v38 = vand.u32 2147483647, %v557_v31  ;;  %vm564_vm6 = vweird.f32 %v557_v31 }
 0x2d5   :  { %v571_v61 = vor.u32 1.1754944e-38, %v570_v40  ;;  %vm569_vm12 = vcmp.eq.f32.partialorder %v568_v38, 8.507059e+37 }
 0x2d8   :  { %v554_v12 = vpop.f32.mrf.mxu1 }
 0x2d9   :  { %v3270_v33 = vpop.eup %3269  ;;  %v558_v35 = vmax.f32 %v554_v12, 1.0 }
 0x2da   :  { %v560_v39 = vmul.f32 %v3270_v33, %v557_v31  ;;  %vm565_vm5 = vweird.f32 %v3270_v33 }
 0x2db   :  { %3271 = vrcp.f32 %v558_v35  ;;  %vm566_vm3 = vmor %vm564_vm6, %vm565_vm5  ;;  %v584_v41 = vand.u32 2147483648, %v558_v35  ;;  %v582_v22 = vand.u32 2147483647, %v558_v35  ;;  %vm578_vm1 = vweird.f32 %v558_v35 }
 0x2dc   :  { %v561_v11 = vsub.f32 1.0, %v560_v39 }
 0x2dd   :  { %v585_v8 = vor.u32 1.1754944e-38, %v584_v41  ;;  %vm583_vm5 = vcmp.eq.f32.partialorder %v582_v22, 8.507059e+37  ;;  %v647_v22 = vmul.u32 8, %v3903_v25 }
 0x2de   :  { %v562_v44 = vmul.f32 %v3270_v33, %v561_v11 }
 0x2e0   :  { %v563_v1 = vadd.f32 %v3270_v33, %v562_v44 }
 0x2e1   :  { %v3272_v59 = vpop.eup %3271 }
 0x2e2   :  { %v567_v63 = vsel %vm566_vm3, %v3270_v33, %v563_v1  ;;  %v574_v5 = vmul.f32 %v3272_v59, %v558_v35  ;;  %vm579_vm4 = vweird.f32 %v3272_v59  ;;  %v625_v33 = vpop.f32.mrf.mxu3 }
 0x2e3   :  { %v572_v28 = vsel %vm569_vm12, %v571_v61, %v567_v63  ;;  %vm580_vm11 = vmor %vm578_vm1, %vm579_vm4  ;;  %v98_v63 = vld [vmem:[%s4682_s9 + $0x3] ss:$0 sm:$0xff] }
 0x2e4   :  { %589 = vperm.xlu0 %3268, %v572_v28   ;;  %v575_v48 = vsub.f32 1.0, %v574_v5  ;;  %v2772_v5 = vpop.f32.mrf.mxu2  ;;  %v639_v28 = vld [vmem:[%s4685_s7 + $0x8] sm:$0xff] }
 0x2e5   :  { %2850 = vmatpush.msrb.mxu3 %v639_v28 }
 0x2e6   :  { %v576_v29 = vmul.f32 %v3272_v59, %v575_v48  ;;  %v648_v48 = vmul.u32 8, %v3889_v24 }
 0x2e8   :  { %v577_v23 = vadd.f32 %v3272_v59, %v576_v29  ;;  %v4025_v29 = vadd.s32 128, %v3410_v27  ;;  %vm655_vm9 = vcmp.ge.s32.totalorder %v3410_v27, %v648_v48 }
 0x2ea   :  { %v581_v31 = vsel %vm580_vm11, %v3272_v59, %v577_v23  ;;  %v628_v1 = vpop.f32.mrf.mxu3  ;;  %vm4719_vm11 = vcmask 64512   ;;  %v660_v23 = vadd.s32 8, %v648_v48  ;;  %vm656_vm4 = vcmp.ge.s32.totalorder %v4025_v29, %v648_v48 }
 0x2eb   :  { %v586_v39 = vsel %vm583_vm5, %v585_v8, %v581_v31  ;;  %v646_v8 = vmul.u32 8, %v3916_v26 }
 0x2ec   :  { %594 = vperm.xlu1 %3267, %v586_v39   ;;  %vm667_vm6 = vcmp.lt.s32.totalorder %v3410_v27, %v660_v23  ;;  %vm668_vm3 = vcmp.lt.s32.totalorder %v4025_v29, %v660_v23  ;;  %v640_v23 = vld [vmem:[%s4686_s8] sm:$0xff] }
 0x2ed   :  { %vm675_vm1 = vmand %vm655_vm9, %vm667_vm6  ;;  %vm651_vm12 = vcmp.ge.s32.totalorder %v3410_v27, %v646_v8  ;;  %vm4759_vm9 = vcmp.ge.s32.totalorder %v3410_v27, %v647_v22 }
 0x2ee   :  { %vm676_vm13 = vmand %vm656_vm4, %vm668_vm3  ;;  %vm4760_vm3 = vcmask 130048  }
 0x356   :  { %v4001_v11 = vpop.permute.xlu0 %589 }
 0x357   :  { %v597_v40 = vmul.f32 %v4001_v11, %v551_v54  ;;  %v638_v54 = vld [vmem:[%s4685_s7] sm:$0xff] }
 0x358   :  { %2821 = vmatpush.msra.mxu1 %v638_v54 }
 0x359   :  { %v631_v44 = vadd.f32 %v625_v33, %v597_v40  ;;  %v659_v33 = vadd.s32 8, %v647_v22 }
 0x35b   :  { %v4010_v59 = vadd.f32 %v631_v44, %v97_v9  ;;  %v658_v44 = vadd.s32 8, %v646_v8  ;;  %vm665_vm10 = vcmp.lt.s32.totalorder %v3410_v27, %v659_v33  ;;  %vm666_vm14 = vcmp.lt.s32.totalorder %v4025_v29, %v659_v33 }
 0x35c   :  { %vm673_vm6 = vmand %vm4759_vm9, %vm665_vm10  ;;  %vm4762_vm9 = vcmask 64512   ;;  %v708_v33 = vadd.s32 248, %v3437_v37 }
 0x35d   :  { %v4721_v40 = vmax.f32 %v4010_v59, 0.0  ;;  %vm663_vm5 = vcmp.lt.s32.totalorder %v3410_v27, %v658_v44  ;;  %vm664_vm4 = vcmp.lt.s32.totalorder %v4025_v29, %v658_v44  ;;  %vm4763_vm8 = vmmov %vm4762_vm9  ;;  %v4098_v44 = vadd.s32 136, %v3410_v27 }
 0x35e   :  { %v4004_v38 = vpop.permute.xlu1 %594 }
 0x35f   :  { %v598_v35 = vmul.f32 %v4004_v38, %v554_v12  ;;  %v2773_v12 = vadd.f32 %v2772_v5, %v98_v63 }
 0x361   :  { %v632_v61 = vadd.f32 %v628_v1, %v598_v35  ;;  %v2784_v39 = vmax.f32 %v2773_v12, 0.0  ;;  %v4758_v1 = vmov 1.0  }
 0x362   :  { %3216 = vmatpush.msk.msrb.mxu2 %vm675_vm1, %v4758_v1  ;;  %3224 = vmatpush.msk.msrb.mxu1 %vm676_vm13, %v4758_v1  ;;  %vm4761_vm1 = vcmp.ge.s32.totalorder %v4025_v29, %v647_v22  ;;  %vm671_vm13 = vmand %vm651_vm12, %vm663_vm5 }
 0x363   :  { %v4022_v41 = vadd.f32 %v632_v61, %v97_v9  ;;  %3204 = vmatmul.msk.f32.vlgmr.msra.gmra.mxu1 %vm4719_vm11, %v2784_v39  ;;  %3208 = vmatmul.msk.f32.vlgmr.msrb.gmra.mxu3 %vm4719_vm11, %v2784_v39  ;;  %vm652_vm11 = vcmp.ge.s32.totalorder %v4025_v29, %v646_v8  ;;  %v2775_v9 = vpop.f32.mrf.mxu2  ;;  %vm674_vm2 = vmand %vm4761_vm1, %vm666_vm14 }
 0x364   :  { %3217 = vmatpush.msk.msrb.mxu2 %vm673_vm6, %v4758_v1  ;;  %v2776_v35 = vadd.f32 %v2775_v9, %v98_v63  ;;  %3225 = vmatpush.msk.msrb.mxu1 %vm674_vm2, %v4758_v1  ;;  %vm672_vm10 = vmand %vm652_vm11, %vm664_vm4  ;;  %v4101_v9 = vadd.s32 144, %v3410_v27 }
 0x365   :  { %v4720_v31 = vmax.f32 %v4022_v41, 0.0  ;;  %vm4764_vm14 = vmmov %vm4763_vm8 }
 0x366   :  { %3218 = vmatpush.msk.msrb.mxu2 %vm671_vm13, %v4758_v1  ;;  %v2785_v61 = vmax.f32 %v2776_v35, 0.0  ;;  %3226 = vmatpush.msk.msrb.mxu1 %vm672_vm10, %v4758_v1  ;;  %vm4765_vm2 = vmmov %vm4763_vm8  ;;  %v4104_v35 = vadd.s32 152, %v3410_v27 }
 0x367   :  { %2878 = vmatpush.msra.mxu0 %v4720_v31  ;;  %vm4766_vm12 = vmmov %vm4760_vm3  ;;  %v4778_v31 = vmov 0.0  }
 0x368   :  { %vm4767_vm11 = vmmov %vm4765_vm2 }
 0x369   :  { %2879 = vmatpush.msra.mxu0 %v4721_v40  ;;  %vm4768_vm5 = vmmov %vm4765_vm2 }
 0x36a   :  { %3212 = vmatmul.msk.f32.vlgmr.msra.gmra.mxu0 %vm4760_vm3, %v3415_v30 }
 0x36b   :  { %3205 = vmatmul.msk.f32.gmra.mxu1 %vm4762_vm9, %v2785_v61  ;;  %3209 = vmatmul.msk.f32.gmra.mxu3 %vm4763_vm8, %v2785_v61  ;;  %v2778_v30 = vpop.f32.mrf.mxu2  ;;  %vm4769_vm8 = vmmov %vm4760_vm3  ;;  %v4107_v61 = vadd.s32 160, %v3410_v27 }
 0x36c   :  { %v2779_v5 = vadd.f32 %v2778_v30, %v98_v63  ;;  %v4110_v30 = vadd.s32 168, %v3410_v27 }
 0x36e   :  { %v2786_v54 = vmax.f32 %v2779_v5, 0.0  ;;  %v4116_v5 = vadd.s32 176, %v3410_v27 }
 0x372   :  { %3213 = vmatmul.msk.f32.gmra.mxu0 %vm4760_vm3, %v3421_v32  ;;  %v645_v32 = vmul.u32 8, %v3437_v37  ;;  %vm4770_vm3 = vcmask 261120  }
 0x373   :  { %3206 = vmatmul.msk.f32.gmra.mxu1 %vm4764_vm14, %v2786_v54  ;;  %3210 = vmatmul.msk.f32.gmra.mxu3 %vm4765_vm2, %v2786_v54  ;;  %v2781_v28 = vpop.f32.mrf.mxu2  ;;  %vm4771_vm14 = vmmov %vm4770_vm3  ;;  %v4122_v54 = vadd.s32 184, %v3410_v27 }
 0x374   :  { %v2782_v48 = vadd.f32 %v2781_v28, %v98_v63  ;;  %v657_v22 = vadd.s32 8, %v645_v32  ;;  %vm649_vm6 = vcmp.ge.s32.totalorder %v3410_v27, %v645_v32  ;;  %vm650_vm1 = vcmp.ge.s32.totalorder %v4025_v29, %v645_v32  ;;  %v641_v63 = vld [vmem:[%s4686_s8 + $0x8] sm:$0xff]  ;;  %vm4772_vm2 = vmmov %vm4770_vm3 }
 0x375   :  { %v4125_v28 = vadd.s32 192, %v3410_v27  ;;  %v4136_v32 = vadd.s32 216, %v3410_v27 }
 0x376   :  { %v2787_v12 = vmax.f32 %v2782_v48, 0.0  ;;  %vm661_vm4 = vcmp.lt.s32.totalorder %v3410_v27, %v657_v22  ;;  %vm662_vm13 = vcmp.lt.s32.totalorder %v4025_v29, %v657_v22  ;;  %v4128_v48 = vadd.s32 200, %v3410_v27 }
 0x377   :  { %vm669_vm10 = vmand %vm649_vm6, %vm661_vm4  ;;  %vm1875_vm4 = vcmp.eq.s32.totalorder %v708_v33, %v4104_v35 }
 0x378   :  { %3219 = vmatpush.msk.msrb.mxu2 %vm669_vm10, %v4758_v1  ;;  %vm670_vm9 = vmand %vm650_vm1, %vm662_vm13  ;;  %vm1940_vm1 = vcmp.eq.s32.totalorder %v708_v33, %v4107_v61  ;;  %vm2005_vm10 = vcmp.eq.s32.totalorder %v708_v33, %v4110_v30 }
 0x379   :  { %3227 = vmatpush.msk.msrb.mxu1 %vm670_vm9, %v4758_v1 }
 0x37a   :  { %3214 = vmatmul.msk.f32.gmra.mxu0 %vm4766_vm12, %v3427_v34  ;;  %v643_v34 = vld [vmem:[%s4686_s8 + $0x18] sm:$0xff]  ;;  %vm4773_vm12 = vmmov %vm4772_vm2 }
 0x37b   :  { %3207 = vmatmul.msk.f32.gmra.mxu1 %vm4767_vm11, %v2787_v12  ;;  %3211 = vmatmul.msk.f32.gmra.mxu3 %vm4768_vm5, %v2787_v12  ;;  %vm1680_vm11 = vcmp.eq.s32.totalorder %v708_v33, %v4025_v29  ;;  %vm1745_vm5 = vcmp.eq.s32.totalorder %v708_v33, %v4098_v44  ;;  %v4132_v12 = vadd.s32 208, %v3410_v27 }
 0x37c   :  { %3072 = vmatpush.msra.mxu1 %v643_v34  ;;  %vm1777_vm6 = vmor %vm1680_vm11, %vm1745_vm5  ;;  %vm2200_vm11 = vcmp.eq.s32.totalorder %v708_v33, %v4125_v28  ;;  %v4140_v34 = vadd.s32 224, %v3410_v27  ;;  %vm4774_vm5 = vcmask 261120  }
 0x382   :  { %3215 = vmatmul.msk.f32.gmra.mxu0 %vm4769_vm8, %v3433_v36  ;;  %v642_v36 = vld [vmem:[%s4686_s8 + $0x10] sm:$0xff]  ;;  %vm1810_vm8 = vcmp.eq.s32.totalorder %v708_v33, %v4101_v9 }
 0x383   :  { %3073 = vmatpush.msra.mxu1 %v642_v36  ;;  %vm1842_vm13 = vmor %vm1777_vm6, %vm1810_vm8  ;;  %v4146_v36 = vadd.s32 232, %v3410_v27 }
 0x384   :  { %vm1907_vm9 = vmor %vm1842_vm13, %vm1875_vm4  ;;  %vm2265_vm4 = vcmp.eq.s32.totalorder %v708_v33, %v4128_v48  ;;  %vm2330_vm13 = vcmp.eq.s32.totalorder %v708_v33, %v4132_v12 }
 0x385   :  { %3074 = vmatpush.msra.mxu1 %v641_v63  ;;  %vm4775_vm8 = vmmov %vm4774_vm5  ;;  %v2558_v63 = vadd.s32 240, %v3410_v27 }
 0x387   :  { %3075 = vmatpush.msra.mxu1 %v640_v23  ;;  %v2623_v23 = vadd.s32 248, %v3410_v27 }
 0x389   :  { %vm2655_vm0 = vcmp.eq.s32.totalorder %v708_v33, %v2623_v23  ;;  %v4179_v23 = vadd.s32 112, %v3410_v27 }
 0x3e7   :  { %v2881_v8 = vpop.f32.mrf.mxu0 }
 0x3e8   :  { %3220 = vmatmul.msk.f32.vlgmr.msrb.gmra.mxu2 %vm4770_vm3, %v2881_v8  ;;  %3228 = vmatmul.msk.f32.vlgmr.msrb.gmra.mxu1 %vm4771_vm14, %v2881_v8  ;;  %vm2070_vm3 = vcmp.eq.s32.totalorder %v708_v33, %v4116_v5  ;;  %vm1972_vm14 = vmor %vm1907_vm9, %vm1940_vm1  ;;  %vm2395_vm9 = vcmp.eq.s32.totalorder %v708_v33, %v4136_v32  ;;  %v707_v8 = vadd.s32 240, %v3437_v37 }
 0x3ef   :  { %v2884_v39 = vpop.f32.mrf.mxu0 }
 0x3f0   :  { %3221 = vmatmul.msk.f32.gmra.mxu2 %vm4772_vm2, %v2884_v39  ;;  %3229 = vmatmul.msk.f32.gmra.mxu1 %vm4773_vm12, %v2884_v39  ;;  %vm2135_vm2 = vcmp.eq.s32.totalorder %v708_v33, %v4122_v54  ;;  %vm2037_vm12 = vmor %vm1972_vm14, %vm2005_vm10  ;;  %v4155_v39 = vadd.s32 120, %v3410_v27 }
 0x3f1   :  { %vm2102_vm6 = vmor %vm2037_vm12, %vm2070_vm3 }
 0x3f2   :  { %vm2167_vm1 = vmor %vm2102_vm6, %vm2135_vm2  ;;  %vm2525_vm2 = vcmp.eq.s32.totalorder %v708_v33, %v4146_v36 }
 0x3f3   :  { %vm2232_vm10 = vmor %vm2167_vm1, %vm2200_vm11  ;;  %vm1615_vm1 = vcmp.eq.s32.totalorder %v707_v8, %v4155_v39 }
 0x3f4   :  { %vm2297_vm14 = vmor %vm2232_vm10, %vm2265_vm4  ;;  %vm1679_vm4 = vcmp.eq.s32.totalorder %v707_v8, %v4025_v29  ;;  %vm4776_vm10 = vcmask 261120  }
 0x3f5   :  { %vm2362_vm3 = vmor %vm2297_vm14, %vm2330_vm13  ;;  %vm1744_vm13 = vcmp.eq.s32.totalorder %v707_v8, %v4098_v44 }
 0x3f6   :  { %vm2427_vm12 = vmor %vm2362_vm3, %vm2395_vm9  ;;  %vm1809_vm3 = vcmp.eq.s32.totalorder %v707_v8, %v4101_v9 }
 0x3f7   :  { %v2887_v22 = vpop.f32.mrf.mxu0  ;;  %vm4777_vm15 = vmmov %vm4776_vm10 }
 0x3f8   :  { %3222 = vmatmul.msk.f32.gmra.mxu2 %vm4774_vm5, %v2887_v22  ;;  %3230 = vmatmul.msk.f32.gmra.mxu1 %vm4775_vm8, %v2887_v22  ;;  %vm2460_vm5 = vcmp.eq.s32.totalorder %v708_v33, %v4140_v34  ;;  %vm2590_vm8 = vcmp.eq.s32.totalorder %v708_v33, %v2558_v63  ;;  %vm1711_vm9 = vmor %vm1615_vm1, %vm1679_vm4  ;;  %v4779_v33 = vmax.f32 %v4010_v59, 0.0  ;;  %vm4780_vm1 = vcmask 261120  }
 0x3f9   :  { %vm2492_vm6 = vmor %vm2427_vm12, %vm2460_vm5  ;;  %vm1874_vm5 = vcmp.eq.s32.totalorder %v707_v8, %v4104_v35  ;;  %vm1939_vm12 = vcmp.eq.s32.totalorder %v707_v8, %v4107_v61  ;;  %v4187_v59 = vadd.s32 104, %v3410_v27 }
 0x3fa   :  { %vm2557_vm11 = vmor %vm2492_vm6, %vm2525_vm2 }
 0x3fb   :  { %vm2622_vm7 = vmor %vm2557_vm11, %vm2590_vm8  ;;  %vm2069_vm8 = vcmp.eq.s32.totalorder %v707_v8, %v4116_v5 }
 0x3fc   :  { %vm2687_vm14 = vmor %vm2622_vm7, %vm2655_vm0  ;;  %vm2134_vm7 = vcmp.eq.s32.totalorder %v707_v8, %v4122_v54 }
 0x3fd   :  { %v3198_v40 = vsel %vm2687_vm14, 1.0, %v4778_v31  ;;  %vm1776_vm2 = vmor %vm1711_vm9, %vm1744_vm13  ;;  %vm2199_vm14 = vcmp.eq.s32.totalorder %v707_v8, %v4125_v28  ;;  %vm2264_vm13 = vcmp.eq.s32.totalorder %v707_v8, %v4128_v48 }
 0x3fe   :  { %3000 = vmatpush.msrb.mxu0 %v3198_v40  ;;  %vm1841_vm6 = vmor %vm1776_vm2, %vm1809_vm3  ;;  %vm2329_vm3 = vcmp.eq.s32.totalorder %v707_v8, %v4132_v12  ;;  %v706_v40 = vadd.s32 232, %v3437_v37 }
 0x3ff   :  { %v2890_v22 = vpop.f32.mrf.mxu0 }
 0x400   :  { %3223 = vmatmul.msk.f32.gmra.mxu2 %vm4776_vm10, %v2890_v22  ;;  %3231 = vmatmul.msk.f32.gmra.mxu1 %vm4777_vm15, %v2890_v22  ;;  %vm2004_vm10 = vcmp.eq.s32.totalorder %v707_v8, %v4110_v30  ;;  %vm1906_vm15 = vmor %vm1841_vm6, %vm1874_vm5  ;;  %vm2394_vm5 = vcmp.eq.s32.totalorder %v707_v8, %v4136_v32  ;;  %vm2459_vm6 = vcmp.eq.s32.totalorder %v707_v8, %v4140_v34  ;;  %v4781_v22 = vmax.f32 %v4022_v41, 0.0 }
 0x401   :  { %vm1971_vm11 = vmor %vm1906_vm15, %vm1939_vm12  ;;  %vm2524_vm15 = vcmp.eq.s32.totalorder %v707_v8, %v4146_v36  ;;  %v4784_v41 = vmov 0 }
 0x402   :  { %vm2036_vm0 = vmor %vm1971_vm11, %vm2004_vm10  ;;  %vm2589_vm11 = vcmp.eq.s32.totalorder %v707_v8, %v2558_v63 }
 0x403   :  { %vm2101_vm4 = vmor %vm2036_vm0, %vm2069_vm8 }
 0x404   :  { %vm2166_vm9 = vmor %vm2101_vm4, %vm2134_vm7  ;;  %vm1549_vm7 = vcmp.eq.s32.totalorder %v706_v40, %v4179_v23  ;;  %vm1678_vm4 = vcmp.eq.s32.totalorder %v706_v40, %v4025_v29 }
 0x405   :  { %vm2231_vm2 = vmor %vm2166_vm9, %vm2199_vm14  ;;  %vm1614_vm14 = vcmp.eq.s32.totalorder %v706_v40, %v4155_v39 }
 0x406   :  { %vm2296_vm12 = vmor %vm2231_vm2, %vm2264_vm13  ;;  %vm4782_vm13 = vcmask 261120  }
 0x407   :  { %vm2361_vm10 = vmor %vm2296_vm12, %vm2329_vm3  ;;  %vm1743_vm3 = vcmp.eq.s32.totalorder %v706_v40, %v4098_v44  ;;  %vm1470_vm12 = vcmp.eq.s32.totalorder %v3447_v42, %v4187_v59 }
 0x408   :  { %3238 = vmatmul.msk.f32.vlgmr.msra.gmra.mxu1 %vm4780_vm1, %v4779_v33  ;;  %vm2426_vm8 = vmor %vm2361_vm10, %vm2394_vm5  ;;  %vm1808_vm5 = vcmp.eq.s32.totalorder %v706_v40, %v4101_v9  ;;  %vm1873_vm10 = vcmp.eq.s32.totalorder %v706_v40, %v4104_v35 }
 0x409   :  { %vm2491_vm0 = vmor %vm2426_vm8, %vm2459_vm6  ;;  %vm1938_vm8 = vcmp.eq.s32.totalorder %v706_v40, %v4107_v61 }
 0x40a   :  { %vm2556_vm1 = vmor %vm2491_vm0, %vm2524_vm15 }
 0x40b   :  { %vm2621_vm9 = vmor %vm2556_vm1, %vm2589_vm11  ;;  %vm2003_vm11 = vcmp.eq.s32.totalorder %v706_v40, %v4110_v30  ;;  %vm4783_vm1 = vnez %v4725_v60  ;;  %v705_v60 = vadd.s32 224, %v3437_v37 }
 0x40c   :  { %v3197_v63 = vsel %vm2621_vm9, 1.0, %v4778_v31  ;;  %vm1646_vm2 = vmor %vm1549_vm7, %vm1614_vm14  ;;  %vm2068_vm14 = vcmp.eq.s32.totalorder %v706_v40, %v4116_v5 }
 0x40d   :  { %3001 = vmatpush.msrb.mxu0 %v3197_v63  ;;  %vm1710_vm6 = vmor %vm1646_vm2, %vm1678_vm4  ;;  %vm2133_vm4 = vcmp.eq.s32.totalorder %v706_v40, %v4122_v54 }
 0x40e   :  { %vm1775_vm15 = vmor %vm1710_vm6, %vm1743_vm3  ;;  %vm2198_vm3 = vcmp.eq.s32.totalorder %v706_v40, %v4125_v28 }
 0x40f   :  { %vm1840_vm0 = vmor %vm1775_vm15, %vm1808_vm5  ;;  %vm2263_vm5 = vcmp.eq.s32.totalorder %v706_v40, %v4128_v48 }
 0x410   :  { %3239 = vmatmul.msk.f32.gmra.mxu1 %vm4782_vm13, %v4781_v22  ;;  %vm4202_vm13 = vmor %vm4783_vm1, %vm1470_vm12  ;;  %vm2328_vm1 = vcmp.eq.s32.totalorder %v706_v40, %v4132_v12 }
 0x411   :  { %v4785_v41 = vsel %vm4202_vm13, 4294967295, %v4784_v41  ;;  %vm1905_vm7 = vmor %vm1840_vm0, %vm1873_vm10  ;;  %vm2393_vm13 = vcmp.eq.s32.totalorder %v706_v40, %v4136_v32  ;;  %vm2458_vm10 = vcmp.eq.s32.totalorder %v706_v40, %v4140_v34 }
 0x412   :  { %vm1970_vm9 = vmor %vm1905_vm7, %vm1938_vm8  ;;  %vm2523_vm7 = vcmp.eq.s32.totalorder %v706_v40, %v4146_v36 }
 0x413   :  { %vm2035_vm2 = vmor %vm1970_vm9, %vm2003_vm11 }
 0x414   :  { %vm2100_vm6 = vmor %vm2035_vm2, %vm2068_vm14  ;;  %vm1535_vm14 = vcmp.eq.s32.totalorder %v3447_v42, %v4179_v23 }
 0x415   :  { %vm2165_vm15 = vmor %vm2100_vm6, %vm2133_vm4  ;;  %vm1600_vm4 = vcmp.eq.s32.totalorder %v3447_v42, %v4155_v39  ;;  %vm1548_vm6 = vcmp.eq.s32.totalorder %v705_v60, %v4179_v23  ;;  %v704_v42 = vadd.s32 216, %v3437_v37 }
 0x416   :  { %vm2230_vm12 = vmor %vm2165_vm15, %vm2198_vm3  ;;  %vm1483_vm3 = vcmp.eq.s32.totalorder %v705_v60, %v4187_v59 }
 0x417   :  { %vm2295_vm0 = vmor %vm2230_vm12, %vm2263_vm5  ;;  %vm4786_vm5 = vnez %v4785_v41  ;;  %vm1677_vm12 = vcmp.eq.s32.totalorder %v705_v60, %v4025_v29  ;;  %v4808_v41 = vld [vmem:[#allocation5_spill] sm:$0xff] }
 0x418   :  { %vm2360_vm8 = vmor %vm2295_vm0, %vm2328_vm1  ;;  %vm1613_vm1 = vcmp.eq.s32.totalorder %v705_v60, %v4155_v39 }
 0x419   :  { %vm2425_vm11 = vmor %vm2360_vm8, %vm2393_vm13 }
 0x41a   :  { %vm2490_vm9 = vmor %vm2425_vm11, %vm2458_vm10  ;;  %vm1742_vm10 = vcmp.eq.s32.totalorder %v705_v60, %v4098_v44 }
 0x41b   :  { %vm2555_vm2 = vmor %vm2490_vm9, %vm2523_vm7  ;;  %vm1807_vm7 = vcmp.eq.s32.totalorder %v705_v60, %v4101_v9  ;;  %vm1872_vm9 = vcmp.eq.s32.totalorder %v705_v60, %v4104_v35 }
 0x41c   :  { %v3196_v8 = vsel %vm2555_vm2, 1.0, %v4778_v31  ;;  %vm1567_vm15 = vmor %vm4786_vm5, %vm1535_vm14  ;;  %vm1937_vm14 = vcmp.eq.s32.totalorder %v705_v60, %v4107_v61 }
 0x41d   :  { %3002 = vmatpush.msrb.mxu0 %v3196_v8  ;;  %vm1632_vm13 = vmor %vm1567_vm15, %vm1600_vm4  ;;  %vm2002_vm4 = vcmp.eq.s32.totalorder %v705_v60, %v4110_v30  ;;  %v695_v8 = vadd.s32 144, %v3437_v37 }
 0x41e   :  { %v3182_v36 = vsel %vm1632_vm13, 1.0, %v4778_v31  ;;  %vm1580_vm0 = vmor %vm1483_vm3, %vm1548_vm6  ;;  %vm2067_vm13 = vcmp.eq.s32.totalorder %v705_v60, %v4116_v5  ;;  %vm2132_vm6 = vcmp.eq.s32.totalorder %v705_v60, %v4122_v54 }
 0x41f   :  { %2971 = vmatpush.msra.mxu3 %v3182_v36  ;;  %vm1645_vm8 = vmor %vm1580_vm0, %vm1613_vm1  ;;  %vm2197_vm1 = vcmp.eq.s32.totalorder %v705_v60, %v4125_v28  ;;  %v4813_v36 = vld [vmem:[#allocation3_spill] sm:$0xff] }
 0x420   :  { %vm1709_vm11 = vmor %vm1645_vm8, %vm1677_vm12  ;;  %vm2262_vm12 = vcmp.eq.s32.totalorder %v705_v60, %v4128_v48 }
 0x421   :  { %vm1774_vm2 = vmor %vm1709_vm11, %vm1742_vm10  ;;  %vm2327_vm11 = vcmp.eq.s32.totalorder %v705_v60, %v4132_v12 }
 0x422   :  { %vm1839_vm5 = vmor %vm1774_vm2, %vm1807_vm7  ;;  %vm2392_vm7 = vcmp.eq.s32.totalorder %v705_v60, %v4136_v32 }
 0x423   :  { %vm1904_vm15 = vmor %vm1839_vm5, %vm1872_vm9  ;;  %vm2457_vm5 = vcmp.eq.s32.totalorder %v705_v60, %v4140_v34  ;;  %v4811_v60 = vmov 0 }
 0x424   :  { %vm1969_vm3 = vmor %vm1904_vm15, %vm1937_vm14 }
 0x425   :  { %vm2034_vm0 = vmor %vm1969_vm3, %vm2002_vm4  ;;  %vm1469_vm4 = vcmp.eq.s32.totalorder %v3535_v58, %v4187_v59 }
 0x426   :  { %vm2099_vm8 = vmor %vm2034_vm0, %vm2067_vm13  ;;  %vm1534_vm13 = vcmp.eq.s32.totalorder %v3535_v58, %v4179_v23  ;;  %vm1482_vm0 = vcmp.eq.s32.totalorder %v704_v42, %v4187_v59  ;;  %v4789_v58 = vmov 0 }
 0x427   :  { %vm2164_vm10 = vmor %vm2099_vm8, %vm2132_vm6  ;;  %vm1417_vm6 = vcmp.eq.s32.totalorder %v704_v42, %v3456_v46 }
 0x428   :  { %vm2229_vm2 = vmor %vm2164_vm10, %vm2197_vm1  ;;  %vm4787_vm1 = vnez %v4727_v0  ;;  %v703_v0 = vadd.s32 208, %v3437_v37 }
 0x429   :  { %vm2294_vm9 = vmor %vm2229_vm2, %vm2262_vm12  ;;  %vm1547_vm12 = vcmp.eq.s32.totalorder %v704_v42, %v4179_v23 }
 0x42a   :  { %vm2359_vm14 = vmor %vm2294_vm9, %vm2327_vm11  ;;  %vm1612_vm11 = vcmp.eq.s32.totalorder %v704_v42, %v4155_v39  ;;  %vm1225_vm9 = vcmp.eq.s32.totalorder %v3588_v62, %v3513_v55 }
 0x42b   :  { %vm2424_vm15 = vmor %vm2359_vm14, %vm2392_vm7  ;;  %vm1676_vm7 = vcmp.eq.s32.totalorder %v704_v42, %v4025_v29  ;;  %vm1741_vm14 = vcmp.eq.s32.totalorder %v704_v42, %v4098_v44 }
 0x42c   :  { %vm2489_vm3 = vmor %vm2424_vm15, %vm2457_vm5 }
 0x42d   :  { %v3195_v33 = vsel %vm2489_vm3, 1.0, %v4778_v31  ;;  %vm1501_vm8 = vmor %vm4787_vm1, %vm1469_vm4  ;;  %vm1806_vm4 = vcmp.eq.s32.totalorder %v704_v42, %v4101_v9  ;;  %vm4788_vm1 = vnez %v4729_v3 }
 0x42e   :  { %3003 = vmatpush.msrb.mxu0 %v3195_v33  ;;  %vm1566_vm10 = vmor %vm1501_vm8, %vm1534_vm13  ;;  %vm1871_vm13 = vcmp.eq.s32.totalorder %v704_v42, %v4104_v35 }
 0x42f   :  { %v3181_v34 = vsel %vm1566_vm10, 1.0, %v4778_v31  ;;  %vm1514_vm2 = vmor %vm1417_vm6, %vm1482_vm0  ;;  %vm1936_vm0 = vcmp.eq.s32.totalorder %v704_v42, %v4107_v61 }
 0x430   :  { %2972 = vmatpush.msra.mxu3 %v3181_v34  ;;  %vm1579_vm5 = vmor %vm1514_vm2, %vm1547_vm12  ;;  %vm2001_vm12 = vcmp.eq.s32.totalorder %v704_v42, %v4110_v30  ;;  %v4816_v34 = vld [vmem:[#allocation4_spill] sm:$0xff] }
 0x431   :  { %vm1644_vm15 = vmor %vm1579_vm5, %vm1612_vm11  ;;  %vm2066_vm11 = vcmp.eq.s32.totalorder %v704_v42, %v4116_v5 }
 0x432   :  { %vm1708_vm3 = vmor %vm1644_vm15, %vm1676_vm7  ;;  %vm2131_vm7 = vcmp.eq.s32.totalorder %v704_v42, %v4122_v54 }
 0x433   :  { %vm4260_vm8 = vmor %vm4788_vm1, %vm1225_vm9  ;;  %vm2196_vm1 = vcmp.eq.s32.totalorder %v704_v42, %v4125_v28 }
 0x434   :  { %v4790_v58 = vsel %vm4260_vm8, 4294967295, %v4789_v58  ;;  %vm1773_vm6 = vmor %vm1708_vm3, %vm1741_vm14  ;;  %vm2261_vm8 = vcmp.eq.s32.totalorder %v704_v42, %v4128_v48  ;;  %vm2326_vm14 = vcmp.eq.s32.totalorder %v704_v42, %v4132_v12 }
 0x435   :  { %vm1838_vm10 = vmor %vm1773_vm6, %vm1806_vm4  ;;  %vm2391_vm6 = vcmp.eq.s32.totalorder %v704_v42, %v4136_v32 }
 0x436   :  { %vm1903_vm2 = vmor %vm1838_vm10, %vm1871_vm13  ;;  %vm1290_vm13 = vcmp.eq.s32.totalorder %v3588_v62, %v3525_v56 }
 0x437   :  { %vm1968_vm5 = vmor %vm1903_vm2, %vm1936_vm0 }
 0x438   :  { %vm2033_vm15 = vmor %vm1968_vm5, %vm2001_vm12  ;;  %vm1355_vm12 = vcmp.eq.s32.totalorder %v3588_v62, %v3530_v57 }
 0x439   :  { %vm2098_vm9 = vmor %vm2033_vm15, %vm2066_vm11  ;;  %vm4791_vm11 = vnez %v4790_v58  ;;  %vm1368_vm15 = vcmp.eq.s32.totalorder %v703_v0, %v3530_v57 }
 0x43a   :  { %vm2163_vm3 = vmor %vm2098_vm9, %vm2131_vm7  ;;  %vm1468_vm7 = vcmp.eq.s32.totalorder %v3588_v62, %v4187_v59  ;;  %vm4792_vm9 = vcmp.eq.s32.totalorder %v3588_v62, %v3456_v46  ;;  %v702_v62 = vadd.s32 200, %v3437_v37 }
 0x43b   :  { %vm2228_vm4 = vmor %vm2163_vm3, %vm2196_vm1  ;;  %vm1416_vm1 = vcmp.eq.s32.totalorder %v703_v0, %v3456_v46 }
 0x43c   :  { %vm2293_vm10 = vmor %vm2228_vm4, %vm2261_vm8 }
 0x43d   :  { %vm2358_vm0 = vmor %vm2293_vm10, %vm2326_vm14  ;;  %vm1481_vm14 = vcmp.eq.s32.totalorder %v703_v0, %v4187_v59 }
 0x43e   :  { %vm2423_vm2 = vmor %vm2358_vm0, %vm2391_vm6  ;;  %vm1546_vm6 = vcmp.eq.s32.totalorder %v703_v0, %v4179_v23 }
 0x43f   :  { %v3194_v3 = vsel %vm2423_vm2, 1.0, %v4778_v31  ;;  %vm1322_vm5 = vmor %vm4791_vm11, %vm1290_vm13  ;;  %vm1611_vm13 = vcmp.eq.s32.totalorder %v703_v0, %v4155_v39  ;;  %vm1740_vm11 = vcmp.eq.s32.totalorder %v703_v0, %v4098_v44 }
 0x440   :  { %3004 = vmatpush.msrb.mxu0 %v3194_v3  ;;  %vm1387_vm8 = vmor %vm1322_vm5, %vm1355_vm12  ;;  %vm1675_vm12 = vcmp.eq.s32.totalorder %v703_v0, %v4025_v29 }
 0x441   :  { %vm1435_vm3 = vmor %vm1387_vm8, %vm4792_vm9  ;;  %vm1805_vm8 = vcmp.eq.s32.totalorder %v703_v0, %v4101_v9 }
 0x442   :  { %vm1500_vm4 = vmor %vm1435_vm3, %vm1468_vm7  ;;  %vm1870_vm7 = vcmp.eq.s32.totalorder %v703_v0, %v4104_v35 }
 0x443   :  { %v3180_v32 = vsel %vm1500_vm4, 1.0, %v4778_v31  ;;  %vm1448_vm10 = vmor %vm1368_vm15, %vm1416_vm1  ;;  %vm1935_vm4 = vcmp.eq.s32.totalorder %v703_v0, %v4107_v61  ;;  %vm2000_vm15 = vcmp.eq.s32.totalorder %v703_v0, %v4110_v30 }
 0x444   :  { %2973 = vmatpush.msra.mxu3 %v3180_v32  ;;  %vm1513_vm0 = vmor %vm1448_vm10, %vm1481_vm14  ;;  %vm2065_vm14 = vcmp.eq.s32.totalorder %v703_v0, %v4116_v5 }
 0x445   :  { %vm1578_vm2 = vmor %vm1513_vm0, %vm1546_vm6  ;;  %vm2130_vm6 = vcmp.eq.s32.totalorder %v703_v0, %v4122_v54 }
 0x446   :  { %vm1643_vm5 = vmor %vm1578_vm2, %vm1611_vm13  ;;  %vm2195_vm13 = vcmp.eq.s32.totalorder %v703_v0, %v4125_v28 }
 0x447   :  { %vm1707_vm9 = vmor %vm1643_vm5, %vm1675_vm12  ;;  %vm2260_vm12 = vcmp.eq.s32.totalorder %v703_v0, %v4128_v48 }
 0x448   :  { %vm1772_vm3 = vmor %vm1707_vm9, %vm1740_vm11  ;;  %vm2325_vm11 = vcmp.eq.s32.totalorder %v703_v0, %v4132_v12  ;;  %v694_v0 = vadd.s32 136, %v3437_v37 }
 0x449   :  { %vm1837_vm1 = vmor %vm1772_vm3, %vm1805_vm8  ;;  %vm1224_vm8 = vcmp.eq.s32.totalorder %v3635_v2, %v3513_v55 }
 0x44a   :  { %vm1902_vm10 = vmor %vm1837_vm1, %vm1870_vm7 }
 0x44b   :  { %vm1967_vm0 = vmor %vm1902_vm10, %vm1935_vm4  ;;  %vm1289_vm4 = vcmp.eq.s32.totalorder %v3635_v2, %v3525_v56  ;;  %vm4793_vm10 = vnez %v4732_v6 }
 0x44c   :  { %vm2032_vm2 = vmor %vm1967_vm0, %vm2000_vm15  ;;  %vm1354_vm15 = vcmp.eq.s32.totalorder %v3635_v2, %v3530_v57 }
 0x44d   :  { %vm2097_vm5 = vmor %vm2032_vm2, %vm2065_vm14  ;;  %vm1367_vm2 = vcmp.eq.s32.totalorder %v702_v62, %v3530_v57 }
 0x44e   :  { %vm2162_vm9 = vmor %vm2097_vm5, %vm2130_vm6  ;;  %vm1302_vm6 = vcmp.eq.s32.totalorder %v702_v62, %v3525_v56  ;;  %vm1415_vm5 = vcmp.eq.s32.totalorder %v702_v62, %v3456_v46 }
 0x44f   :  { %vm2227_vm3 = vmor %vm2162_vm9, %vm2195_vm13 }
 0x450   :  { %vm2292_vm7 = vmor %vm2227_vm3, %vm2260_vm12  ;;  %vm4794_vm12 = vcmp.eq.s32.totalorder %v3635_v2, %v3456_v46  ;;  %v701_v2 = vadd.s32 192, %v3437_v37 }
 0x451   :  { %vm2357_vm1 = vmor %vm2292_vm7, %vm2325_vm11  ;;  %vm1480_vm11 = vcmp.eq.s32.totalorder %v702_v62, %v4187_v59 }
 0x452   :  { %v3193_v40 = vsel %vm2357_vm1, 1.0, %v4778_v31  ;;  %vm1256_vm14 = vmor %vm4793_vm10, %vm1224_vm8  ;;  %vm1545_vm8 = vcmp.eq.s32.totalorder %v702_v62, %v4179_v23 }
 0x453   :  { %3005 = vmatpush.msrb.mxu0 %v3193_v40  ;;  %vm1321_vm0 = vmor %vm1256_vm14, %vm1289_vm4  ;;  %vm1610_vm4 = vcmp.eq.s32.totalorder %v702_v62, %v4155_v39  ;;  %vm1739_vm14 = vcmp.eq.s32.totalorder %v702_v62, %v4098_v44  ;;  %v693_v40 = vadd.s32 128, %v3437_v37 }
 0x454   :  { %vm1386_vm13 = vmor %vm1321_vm0, %vm1354_vm15  ;;  %vm1674_vm15 = vcmp.eq.s32.totalorder %v702_v62, %v4025_v29 }
 0x455   :  { %vm1434_vm9 = vmor %vm1386_vm13, %vm4794_vm12  ;;  %vm1804_vm13 = vcmp.eq.s32.totalorder %v702_v62, %v4101_v9 }
 0x456   :  { %v3179_v12 = vsel %vm1434_vm9, 1.0, %v4778_v31  ;;  %vm1399_vm3 = vmor %vm1302_vm6, %vm1367_vm2  ;;  %vm1869_vm9 = vcmp.eq.s32.totalorder %v702_v62, %v4104_v35  ;;  %vm1934_vm6 = vcmp.eq.s32.totalorder %v702_v62, %v4107_v61 }
 0x457   :  { %2974 = vmatpush.msra.mxu3 %v3179_v12  ;;  %vm1447_vm7 = vmor %vm1399_vm3, %vm1415_vm5  ;;  %vm1999_vm5 = vcmp.eq.s32.totalorder %v702_v62, %v4110_v30 }
 0x458   :  { %vm1512_vm1 = vmor %vm1447_vm7, %vm1480_vm11  ;;  %vm2064_vm11 = vcmp.eq.s32.totalorder %v702_v62, %v4116_v5 }
 0x459   :  { %vm1577_vm10 = vmor %vm1512_vm1, %vm1545_vm8  ;;  %vm2129_vm8 = vcmp.eq.s32.totalorder %v702_v62, %v4122_v54 }
 0x45a   :  { %vm1642_vm0 = vmor %vm1577_vm10, %vm1610_vm4  ;;  %vm2194_vm10 = vcmp.eq.s32.totalorder %v702_v62, %v4125_v28 }
 0x45b   :  { %vm1706_vm12 = vmor %vm1642_vm0, %vm1674_vm15  ;;  %vm2259_vm15 = vcmp.eq.s32.totalorder %v702_v62, %v4128_v48  ;;  %v4823_v62 = vmov 0 }
 0x45c   :  { %vm1771_vm2 = vmor %vm1706_vm12, %vm1739_vm14 }
 0x45d   :  { %vm1836_vm3 = vmor %vm1771_vm2, %vm1804_vm13  ;;  %vm1223_vm13 = vcmp.eq.s32.totalorder %v3677_v4, %v3513_v55 }
 0x45e   :  { %vm1901_vm7 = vmor %vm1836_vm3, %vm1869_vm9  ;;  %vm1288_vm9 = vcmp.eq.s32.totalorder %v3677_v4, %v3525_v56  ;;  %vm4795_vm3 = vnez %v4735_v10 }
 0x45f   :  { %vm1966_vm1 = vmor %vm1901_vm7, %vm1934_vm6  ;;  %vm1353_vm6 = vcmp.eq.s32.totalorder %v3677_v4, %v3530_v57  ;;  %vm1236_vm7 = vcmp.eq.s32.totalorder %v701_v2, %v3513_v55  ;;  %v700_v4 = vadd.s32 184, %v3437_v37 }
 0x460   :  { %vm2031_vm4 = vmor %vm1966_vm1, %vm1999_vm5 }
 0x461   :  { %vm2096_vm0 = vmor %vm2031_vm4, %vm2064_vm11  ;;  %vm1301_vm11 = vcmp.eq.s32.totalorder %v701_v2, %v3525_v56 }
 0x462   :  { %vm2161_vm14 = vmor %vm2096_vm0, %vm2129_vm8  ;;  %vm1366_vm8 = vcmp.eq.s32.totalorder %v701_v2, %v3530_v57 }
 0x463   :  { %vm2226_vm12 = vmor %vm2161_vm14, %vm2194_vm10  ;;  %vm1414_vm10 = vcmp.eq.s32.totalorder %v701_v2, %v3456_v46 }
 0x464   :  { %vm2291_vm2 = vmor %vm2226_vm12, %vm2259_vm15  ;;  %vm1479_vm15 = vcmp.eq.s32.totalorder %v701_v2, %v4187_v59 }
 0x465   :  { %v3192_v6 = vsel %vm2291_vm2, 1.0, %v4778_v31  ;;  %vm1255_vm5 = vmor %vm4795_vm3, %vm1223_vm13  ;;  %vm1544_vm13 = vcmp.eq.s32.totalorder %v701_v2, %v4179_v23  ;;  %vm1609_vm2 = vcmp.eq.s32.totalorder %v701_v2, %v4155_v39 }
 0x466   :  { %3006 = vmatpush.msrb.mxu0 %v3192_v6  ;;  %vm1320_vm1 = vmor %vm1255_vm5, %vm1288_vm9  ;;  %vm1673_vm9 = vcmp.eq.s32.totalorder %v701_v2, %v4025_v29 }
 0x467   :  { %vm1385_vm4 = vmor %vm1320_vm1, %vm1353_vm6  ;;  %vm1738_vm6 = vcmp.eq.s32.totalorder %v701_v2, %v4098_v44 }
 0x468   :  { %v3178_v48 = vsel %vm1385_vm4, 1.0, %v4778_v31  ;;  %vm1333_vm0 = vmor %vm1236_vm7, %vm1301_vm11  ;;  %vm1803_vm4 = vcmp.eq.s32.totalorder %v701_v2, %v4101_v9  ;;  %vm1868_vm11 = vcmp.eq.s32.totalorder %v701_v2, %v4104_v35 }
 0x469   :  { %2975 = vmatpush.msra.mxu3 %v3178_v48  ;;  %vm1398_vm14 = vmor %vm1333_vm0, %vm1366_vm8  ;;  %vm1933_vm8 = vcmp.eq.s32.totalorder %v701_v2, %v4107_v61 }
 0x46a   :  { %vm1446_vm12 = vmor %vm1398_vm14, %vm1414_vm10  ;;  %vm1998_vm14 = vcmp.eq.s32.totalorder %v701_v2, %v4110_v30 }
 0x46b   :  { %vm1511_vm3 = vmor %vm1446_vm12, %vm1479_vm15  ;;  %vm2063_vm15 = vcmp.eq.s32.totalorder %v701_v2, %v4116_v5 }
 0x46c   :  { %vm1576_vm5 = vmor %vm1511_vm3, %vm1544_vm13  ;;  %vm2128_vm13 = vcmp.eq.s32.totalorder %v701_v2, %v4122_v54 }
 0x46d   :  { %vm1641_vm1 = vmor %vm1576_vm5, %vm1609_vm2  ;;  %vm2193_vm5 = vcmp.eq.s32.totalorder %v701_v2, %v4125_v28 }
 0x46e   :  { %vm1705_vm7 = vmor %vm1641_vm1, %vm1673_vm9 }
 0x46f   :  { %vm1770_vm0 = vmor %vm1705_vm7, %vm1738_vm6  ;;  %vm1222_vm6 = vcmp.eq.s32.totalorder %v3715_v7, %v3513_v55 }
 0x470   :  { %vm1835_vm10 = vmor %vm1770_vm0, %vm1803_vm4  ;;  %vm1287_vm4 = vcmp.eq.s32.totalorder %v3715_v7, %v3525_v56  ;;  %vm1235_vm0 = vcmp.eq.s32.totalorder %v700_v4, %v3513_v55  ;;  %v4798_v7 = vmov 0 }
 0x471   :  { %vm1900_vm12 = vmor %vm1835_vm10, %vm1868_vm11  ;;  %vm1170_vm11 = vcmp.eq.s32.totalorder %v700_v4, %v3453_v45 }
 0x472   :  { %vm1965_vm3 = vmor %vm1900_vm12, %vm1933_vm8  ;;  %vm4796_vm8 = vnez %v4738_v14  ;;  %v699_v14 = vadd.s32 176, %v3437_v37 }
 0x473   :  { %vm2030_vm2 = vmor %vm1965_vm3, %vm1998_vm14  ;;  %vm1300_vm14 = vcmp.eq.s32.totalorder %v700_v4, %v3525_v56 }
 0x474   :  { %vm2095_vm9 = vmor %vm2030_vm2, %vm2063_vm15  ;;  %vm1365_vm15 = vcmp.eq.s32.totalorder %v700_v4, %v3530_v57  ;;  %vm978_vm2 = vcmp.eq.s32.totalorder %v3754_v13, %v3486_v50 }
 0x475   :  { %vm2160_vm1 = vmor %vm2095_vm9, %vm2128_vm13  ;;  %vm1413_vm13 = vcmp.eq.s32.totalorder %v700_v4, %v3456_v46  ;;  %vm1478_vm9 = vcmp.eq.s32.totalorder %v700_v4, %v4187_v59 }
 0x476   :  { %vm2225_vm7 = vmor %vm2160_vm1, %vm2193_vm5 }
 0x477   :  { %v3191_v10 = vsel %vm2225_vm7, 1.0, %v4778_v31  ;;  %vm1254_vm10 = vmor %vm4796_vm8, %vm1222_vm6  ;;  %vm1543_vm6 = vcmp.eq.s32.totalorder %v700_v4, %v4179_v23  ;;  %vm4797_vm8 = vnez %v4740_v16 }
 0x478   :  { %3007 = vmatpush.msrb.mxu0 %v3191_v10  ;;  %vm1319_vm12 = vmor %vm1254_vm10, %vm1287_vm4  ;;  %vm1608_vm4 = vcmp.eq.s32.totalorder %v700_v4, %v4155_v39 }
 0x479   :  { %v3177_v28 = vsel %vm1319_vm12, 1.0, %v4778_v31  ;;  %vm1267_vm3 = vmor %vm1170_vm11, %vm1235_vm0  ;;  %vm1672_vm0 = vcmp.eq.s32.totalorder %v700_v4, %v4025_v29 }
 0x47a   :  { %2976 = vmatpush.msra.mxu3 %v3177_v28  ;;  %vm1332_vm5 = vmor %vm1267_vm3, %vm1300_vm14  ;;  %vm1737_vm14 = vcmp.eq.s32.totalorder %v700_v4, %v4098_v44 }
 0x47b   :  { %vm1397_vm1 = vmor %vm1332_vm5, %vm1365_vm15  ;;  %vm1802_vm15 = vcmp.eq.s32.totalorder %v700_v4, %v4101_v9 }
 0x47c   :  { %vm1445_vm7 = vmor %vm1397_vm1, %vm1413_vm13  ;;  %vm1867_vm13 = vcmp.eq.s32.totalorder %v700_v4, %v4104_v35 }
 0x47d   :  { %vm4380_vm10 = vmor %vm4797_vm8, %vm978_vm2  ;;  %vm1932_vm2 = vcmp.eq.s32.totalorder %v700_v4, %v4107_v61 }
 0x47e   :  { %v4799_v7 = vsel %vm4380_vm10, 4294967295, %v4798_v7  ;;  %vm1510_vm11 = vmor %vm1445_vm7, %vm1478_vm9  ;;  %vm1997_vm10 = vcmp.eq.s32.totalorder %v700_v4, %v4110_v30  ;;  %vm2062_vm9 = vcmp.eq.s32.totalorder %v700_v4, %v4116_v5 }
 0x47f   :  { %vm1575_vm12 = vmor %vm1510_vm11, %vm1543_vm6  ;;  %vm2127_vm11 = vcmp.eq.s32.totalorder %v700_v4, %v4122_v54 }
 0x480   :  { %vm1640_vm3 = vmor %vm1575_vm12, %vm1608_vm4  ;;  %vm1043_vm12 = vcmp.eq.s32.totalorder %v3754_v13, %v3495_v51 }
 0x481   :  { %vm1704_vm5 = vmor %vm1640_vm3, %vm1672_vm0 }
 0x482   :  { %vm1769_vm1 = vmor %vm1704_vm5, %vm1737_vm14  ;;  %vm1108_vm14 = vcmp.eq.s32.totalorder %v3754_v13, %v3503_v52 }
 0x483   :  { %vm1834_vm8 = vmor %vm1769_vm1, %vm1802_vm15  ;;  %vm4800_vm15 = vnez %v4799_v7  ;;  %vm1121_vm1 = vcmp.eq.s32.totalorder %v699_v14, %v3503_v52 }
 0x484   :  { %vm1899_vm7 = vmor %vm1834_vm8, %vm1867_vm13  ;;  %vm1221_vm13 = vcmp.eq.s32.totalorder %v3754_v13, %v3513_v55  ;;  %vm4801_vm8 = vcmp.eq.s32.totalorder %v3754_v13, %v3453_v45  ;;  %v698_v13 = vadd.s32 168, %v3437_v37 }
 0x485   :  { %vm1964_vm6 = vmor %vm1899_vm7, %vm1932_vm2  ;;  %vm1169_vm2 = vcmp.eq.s32.totalorder %v699_v14, %v3453_v45 }
 0x486   :  { %vm2029_vm4 = vmor %vm1964_vm6, %vm1997_vm10 }
 0x487   :  { %vm2094_vm0 = vmor %vm2029_vm4, %vm2062_vm9  ;;  %vm1234_vm9 = vcmp.eq.s32.totalorder %v699_v14, %v3513_v55 }
 0x488   :  { %vm2159_vm3 = vmor %vm2094_vm0, %vm2127_vm11  ;;  %vm1299_vm11 = vcmp.eq.s32.totalorder %v699_v14, %v3525_v56 }
 0x489   :  { %v3190_v16 = vsel %vm2159_vm3, 1.0, %v4778_v31  ;;  %vm1075_vm5 = vmor %vm4800_vm15, %vm1043_vm12  ;;  %vm1364_vm12 = vcmp.eq.s32.totalorder %v699_v14, %v3530_v57  ;;  %vm1477_vm15 = vcmp.eq.s32.totalorder %v699_v14, %v4187_v59 }
 0x48a   :  { %3008 = vmatpush.msrb.mxu0 %v3190_v16  ;;  %vm1140_vm10 = vmor %vm1075_vm5, %vm1108_vm14  ;;  %vm1412_vm14 = vcmp.eq.s32.totalorder %v699_v14, %v3456_v46 }
 0x48b   :  { %vm1188_vm7 = vmor %vm1140_vm10, %vm4801_vm8  ;;  %vm1542_vm10 = vcmp.eq.s32.totalorder %v699_v14, %v4179_v23 }
 0x48c   :  { %vm1253_vm6 = vmor %vm1188_vm7, %vm1221_vm13  ;;  %vm1607_vm13 = vcmp.eq.s32.totalorder %v699_v14, %v4155_v39 }
 0x48d   :  { %v3176_v54 = vsel %vm1253_vm6, 1.0, %v4778_v31  ;;  %vm1201_vm4 = vmor %vm1121_vm1, %vm1169_vm2  ;;  %vm1671_vm6 = vcmp.eq.s32.totalorder %v699_v14, %v4025_v29  ;;  %vm1736_vm2 = vcmp.eq.s32.totalorder %v699_v14, %v4098_v44 }
 0x48e   :  { %2977 = vmatpush.msra.mxu3 %v3176_v54  ;;  %vm1266_vm0 = vmor %vm1201_vm4, %vm1234_vm9  ;;  %vm1801_vm9 = vcmp.eq.s32.totalorder %v699_v14, %v4101_v9 }
 0x48f   :  { %vm1331_vm3 = vmor %vm1266_vm0, %vm1299_vm11  ;;  %vm1866_vm11 = vcmp.eq.s32.totalorder %v699_v14, %v4104_v35 }
 0x490   :  { %vm1396_vm5 = vmor %vm1331_vm3, %vm1364_vm12  ;;  %vm1931_vm12 = vcmp.eq.s32.totalorder %v699_v14, %v4107_v61 }
 0x491   :  { %vm1444_vm8 = vmor %vm1396_vm5, %vm1412_vm14  ;;  %vm1996_vm14 = vcmp.eq.s32.totalorder %v699_v14, %v4110_v30 }
 0x492   :  { %vm1509_vm7 = vmor %vm1444_vm8, %vm1477_vm15  ;;  %vm2061_vm15 = vcmp.eq.s32.totalorder %v699_v14, %v4116_v5 }
 0x493   :  { %vm1574_vm1 = vmor %vm1509_vm7, %vm1542_vm10  ;;  %vm977_vm10 = vcmp.eq.s32.totalorder %v3785_v15, %v3486_v50 }
 0x494   :  { %vm1639_vm4 = vmor %vm1574_vm1, %vm1607_vm13 }
 0x495   :  { %vm1703_vm0 = vmor %vm1639_vm4, %vm1671_vm6  ;;  %vm1042_vm6 = vcmp.eq.s32.totalorder %v3785_v15, %v3495_v51  ;;  %vm4802_vm4 = vnez %v4743_v19 }
 0x496   :  { %vm1768_vm3 = vmor %vm1703_vm0, %vm1736_vm2  ;;  %vm1107_vm2 = vcmp.eq.s32.totalorder %v3785_v15, %v3503_v52 }
 0x497   :  { %vm1833_vm5 = vmor %vm1768_vm3, %vm1801_vm9  ;;  %vm1120_vm3 = vcmp.eq.s32.totalorder %v698_v13, %v3503_v52 }
 0x498   :  { %vm1898_vm8 = vmor %vm1833_vm5, %vm1866_vm11  ;;  %vm1055_vm11 = vcmp.eq.s32.totalorder %v698_v13, %v3495_v51  ;;  %vm1168_vm5 = vcmp.eq.s32.totalorder %v698_v13, %v3453_v45 }
 0x499   :  { %vm1963_vm7 = vmor %vm1898_vm8, %vm1931_vm12 }
 0x49a   :  { %vm2028_vm13 = vmor %vm1963_vm7, %vm1996_vm14  ;;  %vm4803_vm14 = vcmp.eq.s32.totalorder %v3785_v15, %v3453_v45  ;;  %v697_v15 = vadd.s32 160, %v3437_v37 }
 0x49b   :  { %vm2093_vm1 = vmor %vm2028_vm13, %vm2061_vm15  ;;  %vm1233_vm15 = vcmp.eq.s32.totalorder %v698_v13, %v3513_v55 }
 0x49c   :  { %v3189_v22 = vsel %vm2093_vm1, 1.0, %v4778_v31  ;;  %vm1009_vm9 = vmor %vm4802_vm4, %vm977_vm10  ;;  %vm1298_vm10 = vcmp.eq.s32.totalorder %v698_v13, %v3525_v56 }
 0x49d   :  { %3009 = vmatpush.msrb.mxu0 %v3189_v22  ;;  %vm1074_vm0 = vmor %vm1009_vm9, %vm1042_vm6  ;;  %vm1363_vm6 = vcmp.eq.s32.totalorder %v698_v13, %v3530_v57  ;;  %vm1476_vm9 = vcmp.eq.s32.totalorder %v698_v13, %v4187_v59 }
 0x49e   :  { %vm1139_vm12 = vmor %vm1074_vm0, %vm1107_vm2  ;;  %vm1411_vm2 = vcmp.eq.s32.totalorder %v698_v13, %v3456_v46 }
 0x49f   :  { %vm1187_vm8 = vmor %vm1139_vm12, %vm4803_vm14  ;;  %vm1541_vm12 = vcmp.eq.s32.totalorder %v698_v13, %v4179_v23 }
 0x4a0   :  { %v3175_v5 = vsel %vm1187_vm8, 1.0, %v4778_v31  ;;  %vm1152_vm7 = vmor %vm1055_vm11, %vm1120_vm3  ;;  %vm1606_vm8 = vcmp.eq.s32.totalorder %v698_v13, %v4155_v39  ;;  %vm1670_vm11 = vcmp.eq.s32.totalorder %v698_v13, %v4025_v29 }
 0x4a1   :  { %2978 = vmatpush.msra.mxu3 %v3175_v5  ;;  %vm1200_vm13 = vmor %vm1152_vm7, %vm1168_vm5  ;;  %vm1735_vm7 = vcmp.eq.s32.totalorder %v698_v13, %v4098_v44 }
 0x4a2   :  { %vm1265_vm1 = vmor %vm1200_vm13, %vm1233_vm15  ;;  %vm1800_vm15 = vcmp.eq.s32.totalorder %v698_v13, %v4101_v9 }
 0x4a3   :  { %vm1330_vm4 = vmor %vm1265_vm1, %vm1298_vm10  ;;  %vm1865_vm10 = vcmp.eq.s32.totalorder %v698_v13, %v4104_v35 }
 0x4a4   :  { %vm1395_vm0 = vmor %vm1330_vm4, %vm1363_vm6  ;;  %vm1930_vm6 = vcmp.eq.s32.totalorder %v698_v13, %v4107_v61 }
 0x4a5   :  { %vm1443_vm14 = vmor %vm1395_vm0, %vm1411_vm2  ;;  %vm1995_vm2 = vcmp.eq.s32.totalorder %v698_v13, %v4110_v30 }
 0x4a6   :  { %vm1508_vm3 = vmor %vm1443_vm14, %vm1476_vm9 }
 0x4a7   :  { %vm1573_vm5 = vmor %vm1508_vm3, %vm1541_vm12  ;;  %vm976_vm12 = vcmp.eq.s32.totalorder %v3810_v17, %v3486_v50 }
 0x4a8   :  { %vm1638_vm13 = vmor %vm1573_vm5, %vm1606_vm8  ;;  %vm1041_vm8 = vcmp.eq.s32.totalorder %v3810_v17, %v3495_v51  ;;  %vm4804_vm5 = vnez %v4745_v21  ;;  %v696_v21 = vadd.s32 152, %v3437_v37 }
 0x4a9   :  { %vm1702_vm1 = vmor %vm1638_vm13, %vm1670_vm11  ;;  %vm1106_vm11 = vcmp.eq.s32.totalorder %v3810_v17, %v3503_v52  ;;  %vm989_vm13 = vcmp.eq.s32.totalorder %v697_v15, %v3486_v50 }
 0x4aa   :  { %vm1767_vm4 = vmor %vm1702_vm1, %vm1735_vm7 }
 0x4ab   :  { %vm1832_vm0 = vmor %vm1767_vm4, %vm1800_vm15  ;;  %vm1054_vm15 = vcmp.eq.s32.totalorder %v697_v15, %v3495_v51 }
 0x4ac   :  { %vm1897_vm9 = vmor %vm1832_vm0, %vm1865_vm10  ;;  %vm1119_vm10 = vcmp.eq.s32.totalorder %v697_v15, %v3503_v52 }
 0x4ad   :  { %vm1962_vm14 = vmor %vm1897_vm9, %vm1930_vm6  ;;  %vm1167_vm6 = vcmp.eq.s32.totalorder %v697_v15, %v3453_v45 }
 0x4ae   :  { %vm2027_vm3 = vmor %vm1962_vm14, %vm1995_vm2  ;;  %vm1232_vm2 = vcmp.eq.s32.totalorder %v697_v15, %v3513_v55 }
 0x4af   :  { %v3188_v19 = vsel %vm2027_vm3, 1.0, %v4778_v31  ;;  %vm1008_vm7 = vmor %vm4804_vm5, %vm976_vm12  ;;  %vm1297_vm12 = vcmp.eq.s32.totalorder %v697_v15, %v3525_v56  ;;  %vm1362_vm3 = vcmp.eq.s32.totalorder %v697_v15, %v3530_v57 }
 0x4b0   :  { %3010 = vmatpush.msrb.mxu0 %v3188_v19  ;;  %vm1073_vm1 = vmor %vm1008_vm7, %vm1041_vm8  ;;  %vm1410_vm8 = vcmp.eq.s32.totalorder %v697_v15, %v3456_v46 }
 0x4b1   :  { %vm1138_vm4 = vmor %vm1073_vm1, %vm1106_vm11  ;;  %vm1475_vm11 = vcmp.eq.s32.totalorder %v697_v15, %v4187_v59 }
 0x4b2   :  { %v3174_v30 = vsel %vm1138_vm4, 1.0, %v4778_v31  ;;  %vm1086_vm0 = vmor %vm989_vm13, %vm1054_vm15  ;;  %vm1540_vm4 = vcmp.eq.s32.totalorder %v697_v15, %v4179_v23  ;;  %vm1605_vm15 = vcmp.eq.s32.totalorder %v697_v15, %v4155_v39 }
 0x4b3   :  { %2979 = vmatpush.msra.mxu3 %v3174_v30  ;;  %vm1151_vm9 = vmor %vm1086_vm0, %vm1119_vm10  ;;  %vm731_vm10 = vcmp.eq.s32.totalorder %v3856_v20, %v3459_v47 }
 0x4b4   :  { %vm1199_vm14 = vmor %vm1151_vm9, %vm1167_vm6  ;;  %vm1669_vm6 = vcmp.eq.s32.totalorder %v697_v15, %v4025_v29 }
 0x4b5   :  { %vm1264_vm5 = vmor %vm1199_vm14, %vm1232_vm2  ;;  %vm1734_vm2 = vcmp.eq.s32.totalorder %v697_v15, %v4098_v44 }
 0x4b6   :  { %vm1329_vm7 = vmor %vm1264_vm5, %vm1297_vm12  ;;  %vm1799_vm12 = vcmp.eq.s32.totalorder %v697_v15, %v4101_v9 }
 0x4b7   :  { %vm1394_vm1 = vmor %vm1329_vm7, %vm1362_vm3  ;;  %vm4805_vm3 = vcmp.eq.s32.totalorder %v3856_v20, %v3410_v27  ;;  %vm1864_vm7 = vcmp.eq.s32.totalorder %v697_v15, %v4104_v35 }
 0x4b8   :  { %vm1442_vm13 = vmor %vm1394_vm1, %vm1410_vm8  ;;  %vm1929_vm1 = vcmp.eq.s32.totalorder %v697_v15, %v4107_v61 }
 0x4b9   :  { %vm1507_vm0 = vmor %vm1442_vm13, %vm1475_vm11  ;;  %vm975_vm13 = vcmp.eq.s32.totalorder %v3831_v18, %v3486_v50 }
 0x4ba   :  { %vm1572_vm9 = vmor %vm1507_vm0, %vm1540_vm4  ;;  %vm1040_vm0 = vcmp.eq.s32.totalorder %v3831_v18, %v3495_v51  ;;  %v4810_v18 = vld [vmem:[#allocation2_spill] sm:$0xff] }
 0x4bb   :  { %vm1637_vm14 = vmor %vm1572_vm9, %vm1605_vm15  ;;  %vm923_vm9 = vcmp.eq.s32.totalorder %v696_v21, %v3450_v43 }
 0x4bc   :  { %vm4482_vm5 = vmor %vm4805_vm3, %vm731_vm10  ;;  %vm1053_vm3 = vcmp.eq.s32.totalorder %v696_v21, %v3495_v51 }
 0x4bd   :  { %vm1701_vm8 = vmor %vm1637_vm14, %vm1669_vm6  ;;  %vm988_vm6 = vcmp.eq.s32.totalorder %v696_v21, %v3486_v50  ;;  %vm4809_vm14 = vnez %v4808_v41 }
 0x4be   :  { %vm1766_vm11 = vmor %vm1701_vm8, %vm1734_vm2  ;;  %vm1118_vm8 = vcmp.eq.s32.totalorder %v696_v21, %v3503_v52 }
 0x4bf   :  { %vm1831_vm4 = vmor %vm1766_vm11, %vm1799_vm12  ;;  %vm1166_vm11 = vcmp.eq.s32.totalorder %v696_v21, %v3453_v45 }
 0x4c0   :  { %vm1896_vm15 = vmor %vm1831_vm4, %vm1864_vm7 }
 0x4c1   :  { %vm1961_vm10 = vmor %vm1896_vm15, %vm1929_vm1  ;;  %vm796_vm1 = vcmp.eq.s32.totalorder %v3856_v20, %v4810_v18  ;;  %vm1231_vm15 = vcmp.eq.s32.totalorder %v696_v21, %v3513_v55 }
 0x4c2   :  { %v3187_v63 = vsel %vm1961_vm10, 1.0, %v4778_v31  ;;  %vm1007_vm2 = vmor %vm4809_vm14, %vm975_vm13  ;;  %vm1296_vm13 = vcmp.eq.s32.totalorder %v696_v21, %v3525_v56 }
 0x4c3   :  { %3011 = vmatpush.msrb.mxu0 %v3187_v63  ;;  %vm1072_vm12 = vmor %vm1007_vm2, %vm1040_vm0  ;;  %vm1361_vm0 = vcmp.eq.s32.totalorder %v696_v21, %v3530_v57 }
 0x4c4   :  { %v3173_v61 = vsel %vm1072_vm12, 1.0, %v4778_v31  ;;  %vm1020_vm7 = vmor %vm923_vm9, %vm988_vm6  ;;  %vm1409_vm6 = vcmp.eq.s32.totalorder %v696_v21, %v3456_v46 }
 0x4c5   :  { %2980 = vmatpush.msra.mxu3 %v3173_v61  ;;  %vm1085_vm4 = vmor %vm1020_vm7, %vm1053_vm3  ;;  %vm1474_vm3 = vcmp.eq.s32.totalorder %v696_v21, %v4187_v59 }
 0x4c6   :  { %vm1150_vm10 = vmor %vm1085_vm4, %vm1118_vm8  ;;  %vm1539_vm8 = vcmp.eq.s32.totalorder %v696_v21, %v4179_v23 }
 0x4c7   :  { %vm1198_vm14 = vmor %vm1150_vm10, %vm1166_vm11  ;;  %vm1604_vm11 = vcmp.eq.s32.totalorder %v696_v21, %v4155_v39 }
 0x4c8   :  { %vm4509_vm2 = vmor %vm4482_vm5, %vm796_vm1  ;;  %vm1668_vm1 = vcmp.eq.s32.totalorder %v696_v21, %v4025_v29 }
 0x4c9   :  { %v4812_v60 = vsel %vm4509_vm2, 4294967295, %v4811_v60  ;;  %vm1263_vm9 = vmor %vm1198_vm14, %vm1231_vm15  ;;  %vm1733_vm2 = vcmp.eq.s32.totalorder %v696_v21, %v4098_v44  ;;  %vm1798_vm15 = vcmp.eq.s32.totalorder %v696_v21, %v4101_v9 }
 0x4ca   :  { %vm1328_vm12 = vmor %vm1263_vm9, %vm1296_vm13  ;;  %vm1863_vm13 = vcmp.eq.s32.totalorder %v696_v21, %v4104_v35  ;;  %v4535_v35 = vpop.f32.mrf.mxu1 }
 0x4cb   :  { %vm1393_vm7 = vmor %vm1328_vm12, %vm1361_vm0 }
 0x4cc   :  { %vm1441_vm4 = vmor %vm1393_vm7, %vm1409_vm6  ;;  %vm861_vm6 = vcmp.eq.s32.totalorder %v3856_v20, %v4813_v36 }
 0x4cd   :  { %vm1506_vm10 = vmor %vm1441_vm4, %vm1474_vm3  ;;  %vm974_vm3 = vcmp.eq.s32.totalorder %v3856_v20, %v3486_v50 }
 0x4ce   :  { %vm1571_vm5 = vmor %vm1506_vm10, %vm1539_vm8  ;;  %vm4814_vm8 = vnez %v4812_v60  ;;  %vm922_vm10 = vcmp.eq.s32.totalorder %v695_v8, %v3450_v43 }
 0x4cf   :  { %vm1636_vm14 = vmor %vm1571_vm5, %vm1604_vm11  ;;  %vm874_vm11 = vcmp.eq.s32.totalorder %v695_v8, %v4813_v36  ;;  %vm987_vm5 = vcmp.eq.s32.totalorder %v695_v8, %v3486_v50 }
 0x4d0   :  { %vm1700_vm9 = vmor %vm1636_vm14, %vm1668_vm1 }
 0x4d1   :  { %vm1765_vm0 = vmor %vm1700_vm9, %vm1733_vm2  ;;  %vm4815_vm2 = vcmp.eq.s32.totalorder %v3856_v20, %v3450_v43  ;;  %v4818_v20 = vmov 0 }
 0x4d2   :  { %vm1830_vm12 = vmor %vm1765_vm0, %vm1798_vm15  ;;  %vm1052_vm15 = vcmp.eq.s32.totalorder %v695_v8, %v3495_v51  ;;  %vm730_vm0 = vcmp.eq.s32.totalorder %v4816_v34, %v3459_v47  ;;  %v4557_v58 = vpop.f32.mrf.mxu1 }
 0x4d3   :  { %vm1895_vm7 = vmor %vm1830_vm12, %vm1863_vm13  ;;  %vm1117_vm13 = vcmp.eq.s32.totalorder %v695_v8, %v3503_v52  ;;  %vm1165_vm12 = vcmp.eq.s32.totalorder %v695_v8, %v3453_v45 }
 0x4d4   :  { %v3186_v42 = vsel %vm1895_vm7, 1.0, %v4778_v31  ;;  %vm893_vm4 = vmor %vm4814_vm8, %vm861_vm6  ;;  %vm1230_vm8 = vcmp.eq.s32.totalorder %v695_v8, %v3513_v55 }
 0x4d5   :  { %3012 = vmatpush.msrb.mxu0 %v3186_v42  ;;  %vm941_vm1 = vmor %vm893_vm4, %vm4815_vm2  ;;  %vm4817_vm2 = vcmp.eq.s32.totalorder %v4816_v34, %v3410_v27 }
 0x4d6   :  { %vm1006_vm14 = vmor %vm941_vm1, %vm974_vm3  ;;  %vm1295_vm3 = vcmp.eq.s32.totalorder %v695_v8, %v3525_v56 }
 0x4d7   :  { %v3172_v33 = vsel %vm1006_vm14, 1.0, %v4778_v31  ;;  %vm954_vm9 = vmor %vm874_vm11, %vm922_vm10  ;;  %vm1360_vm10 = vcmp.eq.s32.totalorder %v695_v8, %v3530_v57 }
 0x4d8   :  { %2981 = vmatpush.msra.mxu3 %v3172_v33  ;;  %vm1019_vm6 = vmor %vm954_vm9, %vm987_vm5  ;;  %vm1408_vm5 = vcmp.eq.s32.totalorder %v695_v8, %v3456_v46  ;;  %v101_v33 = vld [vmem:[%s4682_s9 + $0x5] ss:$0 sm:$0xff] }
 0x4d9   :  { %vm1084_vm7 = vmor %vm1019_vm6, %vm1052_vm15  ;;  %vm1473_vm15 = vcmp.eq.s32.totalorder %v695_v8, %v4187_v59 }
 0x4da   :  { %vm1149_vm4 = vmor %vm1084_vm7, %vm1117_vm13  ;;  %vm1538_vm13 = vcmp.eq.s32.totalorder %v695_v8, %v4179_v23  ;;  %v4581_v32 = vpop.f32.mrf.mxu1 }
 0x4db   :  { %vm4548_vm1 = vmor %vm4817_vm2, %vm730_vm0  ;;  %vm1603_vm0 = vcmp.eq.s32.totalorder %v695_v8, %v4155_v39 }
 0x4dc   :  { %v4819_v20 = vsel %vm4548_vm1, 4294967295, %v4818_v20  ;;  %vm1197_vm11 = vmor %vm1149_vm4, %vm1165_vm12  ;;  %vm1667_vm1 = vcmp.eq.s32.totalorder %v695_v8, %v4025_v29  ;;  %vm1732_vm4 = vcmp.eq.s32.totalorder %v695_v8, %v4098_v44 }
 0x4dd   :  { %vm1262_vm14 = vmor %vm1197_vm11, %vm1230_vm8  ;;  %vm1797_vm11 = vcmp.eq.s32.totalorder %v695_v8, %v4101_v9 }
 0x4de   :  { %vm1327_vm9 = vmor %vm1262_vm14, %vm1295_vm3 }
 0x4df   :  { %vm1392_vm6 = vmor %vm1327_vm9, %vm1360_vm10  ;;  %vm795_vm10 = vcmp.eq.s32.totalorder %v4816_v34, %v4810_v18 }
 0x4e0   :  { %vm1440_vm7 = vmor %vm1392_vm6, %vm1408_vm5  ;;  %vm860_vm5 = vcmp.eq.s32.totalorder %v4816_v34, %v4813_v36 }
 0x4e1   :  { %vm1505_vm2 = vmor %vm1440_vm7, %vm1473_vm15  ;;  %vm4820_vm15 = vnez %v4819_v20  ;;  %vm873_vm7 = vcmp.eq.s32.totalorder %v694_v0, %v4813_v36 }
 0x4e2   :  { %vm1570_vm12 = vmor %vm1505_vm2, %vm1538_vm13  ;;  %vm808_vm13 = vcmp.eq.s32.totalorder %v694_v0, %v4810_v18  ;;  %vm4821_vm2 = vcmp.eq.s32.totalorder %v4816_v34, %v3450_v43  ;;  %v4601_v12 = vpop.f32.mrf.mxu1 }
 0x4e3   :  { %vm1635_vm8 = vmor %vm1570_vm12, %vm1603_vm0 }
 0x4e4   :  { %vm1699_vm3 = vmor %vm1635_vm8, %vm1667_vm1  ;;  %vm921_vm1 = vcmp.eq.s32.totalorder %v694_v0, %v3450_v43 }
 0x4e5   :  { %vm1764_vm14 = vmor %vm1699_vm3, %vm1732_vm4  ;;  %vm986_vm4 = vcmp.eq.s32.totalorder %v694_v0, %v3486_v50  ;;  %vm729_vm3 = vcmp.eq.s32.totalorder %v3889_v24, %v3459_v47 }
 0x4e6   :  { %vm1829_vm9 = vmor %vm1764_vm14, %vm1797_vm11  ;;  %vm1051_vm11 = vcmp.eq.s32.totalorder %v694_v0, %v3495_v51  ;;  %vm1116_vm14 = vcmp.eq.s32.totalorder %v694_v0, %v3503_v52 }
 0x4e7   :  { %v3185_v3 = vsel %vm1829_vm9, 1.0, %v4778_v31  ;;  %vm827_vm6 = vmor %vm4820_vm15, %vm795_vm10  ;;  %vm1164_vm9 = vcmp.eq.s32.totalorder %v694_v0, %v3453_v45 }
 0x4e8   :  { %3013 = vmatpush.msrb.mxu0 %v3185_v3  ;;  %vm892_vm0 = vmor %vm827_vm6, %vm860_vm5  ;;  %vm1229_vm6 = vcmp.eq.s32.totalorder %v694_v0, %v3513_v55 }
 0x4e9   :  { %vm940_vm12 = vmor %vm892_vm0, %vm4821_vm2  ;;  %vm1294_vm2 = vcmp.eq.s32.totalorder %v694_v0, %v3525_v56 }
 0x4ea   :  { %v3171_v9 = vsel %vm940_vm12, 1.0, %v4778_v31  ;;  %vm905_vm8 = vmor %vm808_vm13, %vm873_vm7  ;;  %vm4822_vm13 = vcmp.eq.s32.totalorder %v3889_v24, %v3410_v27 }
 0x4eb   :  { %2982 = vmatpush.msra.mxu3 %v3171_v9  ;;  %vm953_vm10 = vmor %vm905_vm8, %vm921_vm1  ;;  %vm1359_vm1 = vcmp.eq.s32.totalorder %v694_v0, %v3530_v57 }
 0x4ec   :  { %vm1018_vm5 = vmor %vm953_vm10, %vm986_vm4  ;;  %vm1407_vm4 = vcmp.eq.s32.totalorder %v694_v0, %v3456_v46 }
 0x4ed   :  { %vm1083_vm15 = vmor %vm1018_vm5, %vm1051_vm11  ;;  %vm1472_vm11 = vcmp.eq.s32.totalorder %v694_v0, %v4187_v59 }
 0x4ee   :  { %vm4589_vm7 = vmor %vm4822_vm13, %vm729_vm3  ;;  %vm1537_vm3 = vcmp.eq.s32.totalorder %v694_v0, %v4179_v23 }
 0x4ef   :  { %v4824_v62 = vsel %vm4589_vm7, 4294967295, %v4823_v62  ;;  %vm1148_vm0 = vmor %vm1083_vm15, %vm1116_vm14  ;;  %vm1602_vm7 = vcmp.eq.s32.totalorder %v694_v0, %v4155_v39  ;;  %vm1666_vm15 = vcmp.eq.s32.totalorder %v694_v0, %v4025_v29 }
 0x4f0   :  { %vm1196_vm12 = vmor %vm1148_vm0, %vm1164_vm9 }
 0x4f1   :  { %vm1261_vm8 = vmor %vm1196_vm12, %vm1229_vm6  ;;  %vm1731_vm6 = vcmp.eq.s32.totalorder %v694_v0, %v4098_v44 }
 0x4f2   :  { %vm1326_vm10 = vmor %vm1261_vm8, %vm1294_vm2  ;;  %vm794_vm2 = vcmp.eq.s32.totalorder %v3889_v24, %v4810_v18 }
 0x4f3   :  { %vm1391_vm5 = vmor %vm1326_vm10, %vm1359_vm1  ;;  %vm859_vm1 = vcmp.eq.s32.totalorder %v3889_v24, %v4813_v36  ;;  %vm807_vm10 = vcmp.eq.s32.totalorder %v693_v40, %v4810_v18  ;;  %v2852_v24 = vpop.f32.mrf.mxu3 }
 0x4f4   :  { %vm1439_vm13 = vmor %vm1391_vm5, %vm1407_vm4  ;;  %vm742_vm4 = vcmp.eq.s32.totalorder %v693_v40, %v3459_v47 }
 0x4f5   :  { %vm1504_vm14 = vmor %vm1439_vm13, %vm1472_vm11  ;;  %vm4825_vm11 = vnez %v4824_v62  ;;  %vm920_vm13 = vcmp.eq.s32.totalorder %v693_v40, %v3450_v43 }
 0x4f6   :  { %vm1569_vm9 = vmor %vm1504_vm14, %vm1537_vm3  ;;  %vm872_vm3 = vcmp.eq.s32.totalorder %v693_v40, %v4813_v36 }
 0x4f7   :  { %vm1634_vm0 = vmor %vm1569_vm9, %vm1602_vm7  ;;  %vm728_vm9 = vcmp.eq.s32.totalorder %v3903_v25, %v3459_v47 }
 0x4f8   :  { %vm1698_vm12 = vmor %vm1634_vm0, %vm1666_vm15  ;;  %vm985_vm15 = vcmp.eq.s32.totalorder %v693_v40, %v3486_v50  ;;  %vm1050_vm0 = vcmp.eq.s32.totalorder %v693_v40, %v3495_v51  ;;  %v2951_v50 = vpop.f32.mrf.mxu1  ;;  %v3101_v51 = vld [vmem:[%s4682_s9 + $0x4] ss:$8 sm:$0x3] }
 0x4f9   :  { %vm1763_vm8 = vmor %vm1698_vm12, %vm1731_vm6 }
 0x4fa   :  { %v3184_v2 = vsel %vm1763_vm8, 1.0, %v4778_v31  ;;  %vm826_vm5 = vmor %vm4825_vm11, %vm794_vm2  ;;  %vm1115_vm2 = vcmp.eq.s32.totalorder %v693_v40, %v3503_v52  ;;  %vm4826_vm11 = vcmp.eq.s32.totalorder %v3903_v25, %v3410_v27  ;;  %v2922_v52 = vpop.f32.mrf.mxu2 }
 0x4fb   :  { %3014 = vmatpush.msrb.mxu0 %v3184_v2  ;;  %vm891_vm7 = vmor %vm826_vm5, %vm859_vm1  ;;  %vm1163_vm1 = vcmp.eq.s32.totalorder %v693_v40, %v3453_v45  ;;  %v2790_v45 = vperm.slane %v3101_v51, 1 }
 0x4fc   :  { %3232 = vmatpush.msk.msra.mxu3 %vm891_vm7, %v4758_v1  ;;  %vm839_vm14 = vmor %vm742_vm4, %vm807_vm10  ;;  %vm1228_vm10 = vcmp.eq.s32.totalorder %v693_v40, %v3513_v55  ;;  %vm1293_vm7 = vcmp.eq.s32.totalorder %v693_v40, %v3525_v56  ;;  %v2789_v55 = vperm.slane %v3101_v51, 0 }
 0x4fd   :  { %vm904_vm6 = vmor %vm839_vm14, %vm872_vm3  ;;  %vm1358_vm14 = vcmp.eq.s32.totalorder %v693_v40, %v3530_v57  ;;  %v2853_v56 = vadd.f32 %v2852_v24, %v2790_v45  ;;  %v2855_v57 = vpop.f32.mrf.mxu3 }
 0x4fe   :  { %vm952_vm12 = vmor %vm904_vm6, %vm920_vm13  ;;  %v2827_v6 = vadd.f32 %v4557_v58, %v2789_v55  ;;  %v2830_v7 = vadd.f32 %v4581_v32, %v2789_v55  ;;  %v2833_v13 = vadd.f32 %v4601_v12, %v2789_v55 }
 0x4ff   :  { %vm1017_vm8 = vmor %vm952_vm12, %vm985_vm15  ;;  %vm1471_vm12 = vcmp.eq.s32.totalorder %v693_v40, %v4187_v59 }
 0x500   :  { %vm4625_vm5 = vmor %vm4826_vm11, %vm728_vm9  ;;  %vm1406_vm9 = vcmp.eq.s32.totalorder %v693_v40, %v3456_v46  ;;  %vm1601_vm11 = vcmp.eq.s32.totalorder %v693_v40, %v4155_v39  ;;  %v2964_v46 = vmul.f32 %v2951_v50, %v2853_v56  ;;  %v2954_v44 = vpop.f32.mrf.mxu1 }
 0x501   :  { %vm1082_vm4 = vmor %vm1017_vm8, %vm1050_vm0 }
 0x502   :  { %vm1147_vm3 = vmor %vm1082_vm4, %vm1115_vm2  ;;  %vm1536_vm2 = vcmp.eq.s32.totalorder %v693_v40, %v4179_v23  ;;  %v2824_v23 = vadd.f32 %v4535_v35, %v2789_v55 }
 0x503   :  { %vm1195_vm13 = vmor %vm1147_vm3, %vm1163_vm1  ;;  %vm1665_vm1 = vcmp.eq.s32.totalorder %v693_v40, %v4025_v29  ;;  %v2856_v29 = vadd.f32 %v2855_v57, %v2790_v45 }
 0x504   :  { %vm1260_vm15 = vmor %vm1195_vm13, %vm1228_vm10  ;;  %vm793_vm10 = vcmp.eq.s32.totalorder %v3903_v25, %v4810_v18  ;;  %vm727_vm13 = vcmp.eq.s32.totalorder %v3916_v26, %v3459_v47  ;;  %v2963_v25 = vmul.f32 %v2922_v52, %v2824_v23  ;;  %v2925_v47 = vpop.f32.mrf.mxu2 }
 0x505   :  { %vm1325_vm6 = vmor %vm1260_vm15, %vm1293_vm7  ;;  %v2858_v59 = vpop.f32.mrf.mxu3 }
 0x506   :  { %vm1390_vm0 = vmor %vm1325_vm6, %vm1358_vm14  ;;  %v2859_v4 = vadd.f32 %v2858_v59, %v2790_v45 }
 0x507   :  { %vm1438_vm8 = vmor %vm1390_vm0, %vm1406_vm9  ;;  %vm4829_vm9 = vcmp.eq.s32.totalorder %v3916_v26, %v3410_v27  ;;  %v2965_v26 = vmul.f32 %v2925_v47, %v2827_v6 }
 0x508   :  { %vm1503_vm4 = vmor %vm1438_vm8, %vm1471_vm12  ;;  %vm4830_vm12 = vcmp.eq.s32.totalorder %v3437_v37, %v3410_v27  ;;  %v2957_v48 = vpop.f32.mrf.mxu1 }
 0x509   :  { %vm1568_vm3 = vmor %vm1503_vm4, %vm1536_vm2  ;;  %v2968_v28 = vmul.f32 %v2957_v48, %v2859_v4  ;;  %vm4833_vm2 = vcmask 64512  }
 0x50a   :  { %vm1633_vm7 = vmor %vm1568_vm3, %vm1601_vm11 }
 0x50b   :  { %vm1697_vm14 = vmor %vm1633_vm7, %vm1665_vm1 }
 0x50c   :  { %v3183_v39 = vsel %vm1697_vm14, 1.0, %v4778_v31  ;;  %vm825_vm15 = vmor %vm4625_vm5, %vm793_vm10  ;;  %v2966_v31 = vmul.f32 %v2954_v44, %v2856_v29  ;;  %v2928_v10 = vpop.f32.mrf.mxu2  ;;  %vm4831_vm5 = vcmask 261120  }
 0x50d   :  { %3015 = vmatpush.msrb.mxu0 %v3183_v39  ;;  %3233 = vmatpush.msk.msra.mxu3 %vm825_vm15, %v4758_v1  ;;  %vm759_vm6 = vmor %vm4829_vm9, %vm727_vm13  ;;  %v2861_v14 = vpop.f32.mrf.mxu3  ;;  %v2967_v16 = vmul.f32 %v2928_v10, %v2830_v7 }
 0x50e   :  { %3016 = vmatmul.f32.vlgmr.msrb.gmra.mxu0 %v2964_v46  ;;  %v2862_v27 = vadd.f32 %v2861_v14, %v2790_v45  ;;  %vm4832_vm0 = vmmov %vm4831_vm5 }
 0x50f   :  { %3234 = vmatpush.msk.msra.mxu3 %vm759_vm6, %v4758_v1  ;;  %vm4834_vm8 = vmmov %vm4833_vm2 }
 0x510   :  { %v2960_v54 = vpop.f32.mrf.mxu1 }
 0x511   :  { %3235 = vmatpush.msk.msra.mxu3 %vm4830_vm12, %v4758_v1  ;;  %v2970_v37 = vmul.f32 %v2960_v54, %v2862_v27 }
 0x512   :  { %2987 = vmatmul.f32.vlgmr.msra.gmra.mxu3 %v2963_v25 }
 0x514   :  { %v2931_v1 = vpop.f32.mrf.mxu2 }
 0x515   :  { %v2969_v22 = vmul.f32 %v2931_v1, %v2833_v13 }
 0x516   :  { %3019 = vmatmul.f32.gmra.mxu0 %v2966_v31 }
 0x518   :  { %v3077_v36 = vpop.f32.mrf.mxu1 }
 0x51a   :  { %2990 = vmatmul.f32.gmra.mxu3 %v2965_v26 }
 0x51e   :  { %3022 = vmatmul.f32.gmra.mxu0 %v2968_v28 }
 0x520   :  { %v3080_v0 = vpop.f32.mrf.mxu1 }
 0x522   :  { %2993 = vmatmul.f32.gmra.mxu3 %v2967_v16 }
 0x526   :  { %3025 = vmatmul.f32.gmra.mxu0 %v2970_v37 }
 0x52a   :  { %2996 = vmatmul.f32.gmra.mxu3 %v2969_v22 }
 0x58b   :  { %v3017_v5 = vpop.f32.mrf.mxu0 }
 0x593   :  { %v3020_v19 = vpop.f32.mrf.mxu0 }
 0x595   :  { %v2988_v15 = vpop.f32.mrf.mxu3 }
 0x596   :  { %v3018_v8 = vadd.f32 %v3017_v5, %v2988_v15 }
 0x59b   :  { %v3023_v17 = vpop.f32.mrf.mxu0 }
 0x59d   :  { %v2991_v30 = vpop.f32.mrf.mxu3 }
 0x59e   :  { %v3021_v60 = vadd.f32 %v3020_v19, %v2991_v30 }
 0x5a3   :  { %v3026_v63 = vpop.f32.mrf.mxu0 }
 0x5a5   :  { %v2994_v21 = vpop.f32.mrf.mxu3 }
 0x5a6   :  { %v3024_v18 = vadd.f32 %v3023_v17, %v2994_v21 }
 0x5ad   :  { %v2997_v41 = vpop.f32.mrf.mxu3 }
 0x5ae   :  { %v3027_v61 = vadd.f32 %v3026_v63, %v2997_v41 }
 0x5b0   :  { %3041 = vmatpush.msra.mxu2 %v3027_v61 }
 0x5b2   :  { %3042 = vmatpush.msra.mxu2 %v3024_v18 }
 0x5b4   :  { %3043 = vmatpush.msra.mxu2 %v3021_v60 }
 0x5b6   :  { %3044 = vmatpush.msra.mxu2 %v3018_v8 }
 0x5b7   :  { %3236 = vmatmul.msk.f32.vlgmr.msra.gmra.mxu2 %vm4831_vm5, %v3971_v53 }
 0x5bf   :  { %3237 = vmatmul.msk.f32.gmra.mxu2 %vm4832_vm0, %v3977_v49 }
 0x63a   :  { %v3046_v42 = vpop.f32.mrf.mxu2 }
 0x63b   :  { %v3052_v35 = vmul.f32 %v3046_v42, %v4001_v11 }
 0x63d   :  { %v3083_v34 = vadd.f32 %v3077_v36, %v3052_v35 }
 0x63f   :  { %v3085_v20 = vadd.f32 %v3083_v34, %v101_v33 }
 0x641   :  { %3087 = vst.msk [vmem:[%s4687_s10] sm:$0xff] %vm4833_vm2, %v3085_v20 }
 0x642   :  { %v3049_v58 = vpop.f32.mrf.mxu2 }
 0x643   :  { %v3053_v53 = vmul.f32 %v3049_v58, %v4004_v38 }
 0x645   :  { %v3084_v49 = vadd.f32 %v3080_v0, %v3053_v53 }
 0x647   :  { %v3086_v3 = vadd.f32 %v3084_v49, %v101_v33 }
 0x649   :  { %3088 = vst.msk [vmem:[%s4687_s10 + $0x8] sm:$0xff] %vm4834_vm8, %v3086_v3 }

</bundles_post_ra>
